<compile_context>
chip_gen: v7x
topology: tpu7x:2x2x1
jax: 0.10.0
libtpu: 0.0.40
codegen_flags: <defaults>
</compile_context>

<pallas_src>
import functools
import math

import jax
import jax.numpy as jnp
from jax.experimental import pallas as pl
from jax.experimental.pallas import tpu as pltpu

MXU_DTYPE = jnp.bfloat16   # matmul operand dtype (f32 accumulation everywhere)
ACT_DTYPE = jnp.float32    # activation / LayerNorm / softmax dtype
LN_EPS = 1e-5
NEG_INF = -1e30


# ----------------------------------------------------------------------------
# Small helpers
# ----------------------------------------------------------------------------
def _row_tile(m, max_rows=1024):
    """Largest row tile that divides m, is a multiple of 8, and is <= max_rows."""
    if m <= max_rows:
        return m
    t = max_rows - (max_rows % 8)
    while t >= 8:
        if m % t == 0:
            return t
        t -= 8
    return m


def _parallel(n=1):
    return pltpu.CompilerParams(dimension_semantics=("parallel",) * n)


def _layernorm(z, g, b):
    mean = jnp.mean(z, axis=-1, keepdims=True)
    var = jnp.mean((z - mean) ** 2, axis=-1, keepdims=True)
    return (z - mean) * jax.lax.rsqrt(var + LN_EPS) * g + b


# ----------------------------------------------------------------------------
# Pallas kernels
# ----------------------------------------------------------------------------
def _linear_kernel(x_ref, w_ref, b_ref, o_ref, *, activation):
    """y = x @ W + b (optional ReLU). bf16 MXU operands, f32 accumulate."""
    y = jnp.dot(x_ref[...].astype(MXU_DTYPE), w_ref[...].astype(MXU_DTYPE),
                preferred_element_type=jnp.float32) + b_ref[...]
    if activation == "relu":
        y = jnp.maximum(y, 0.0)
    o_ref[...] = y.astype(o_ref.dtype)


def _linear_split_kernel(x_ref, w_ref, b_ref, *out_refs):
    """Fused projection against a concatenated weight; writes N lane-dense outputs."""
    y = jnp.dot(x_ref[...].astype(MXU_DTYPE), w_ref[...].astype(MXU_DTYPE),
                preferred_element_type=jnp.float32) + b_ref[...]
    d = y.shape[1] // len(out_refs)
    for i, o_ref in enumerate(out_refs):
        o_ref[...] = y[:, i * d:(i + 1) * d].astype(o_ref.dtype)


def _proj_add_ln_kernel(ctx_ref, res_ref, w_ref, b_ref, g_ref, beta_ref, o_ref):
    """out = LayerNorm(residual + (ctx @ Wo + bo))   (dropout = identity)."""
    y = jnp.dot(ctx_ref[...].astype(MXU_DTYPE), w_ref[...].astype(MXU_DTYPE),
                preferred_element_type=jnp.float32) + b_ref[...]
    z = res_ref[...].astype(jnp.float32) + y
    o_ref[...] = _layernorm(z, g_ref[...], beta_ref[...]).astype(o_ref.dtype)


def _ffn_add_ln_kernel(x_ref, w1_ref, b1_ref, w2_ref, b2_ref, g_ref, beta_ref, o_ref):
    """out = LayerNorm(x + FFN2(ReLU(FFN1(x)))) with the hidden kept on-chip."""
    x = x_ref[...]
    h = jnp.dot(x.astype(MXU_DTYPE), w1_ref[...].astype(MXU_DTYPE),
                preferred_element_type=jnp.float32) + b1_ref[...]
    h = jnp.maximum(h, 0.0)
    y = jnp.dot(h.astype(MXU_DTYPE), w2_ref[...].astype(MXU_DTYPE),
                preferred_element_type=jnp.float32) + b2_ref[...]
    z = x.astype(jnp.float32) + y
    o_ref[...] = _layernorm(z, g_ref[...], beta_ref[...]).astype(o_ref.dtype)


def _mha_kernel(q_ref, k_ref, v_ref, o_ref, *, num_heads, scale, causal):
    """All-heads attention for one batch element.

    q:(1,Sq,D) k,v:(1,Sk,D) -> o:(1,Sq,D).  Mask generated in-kernel (causal only).
    Output store is lane-dense (last dim = D = H*dh).
    """
    q = q_ref[0].astype(jnp.float32) * scale       # scale folded into q (Sq*D muls)
    k = k_ref[0]
    v = v_ref[0]
    sq, d_model = q.shape
    sk = k.shape[0]
    dh = d_model // num_heads

    if causal:
        row = jax.lax.broadcasted_iota(jnp.int32, (sq, sk), 0)
        col = jax.lax.broadcasted_iota(jnp.int32, (sq, sk), 1)
        keep = col <= row

    outs = []
    for h in range(num_heads):                     # static unroll over heads
        lo, hi = h * dh, (h + 1) * dh
        qh = q[:, lo:hi].astype(MXU_DTYPE)
        kh = k[:, lo:hi].astype(MXU_DTYPE)
        vh = v[:, lo:hi].astype(MXU_DTYPE)
        s = jnp.dot(qh, kh.T, preferred_element_type=jnp.float32)
        if causal:
            s = jnp.where(keep, s, NEG_INF)
        s = s - jnp.max(s, axis=-1, keepdims=True)
        p = jnp.exp(s)
        p = p * pl.reciprocal(jnp.sum(p, axis=-1, keepdims=True), approx=True)
        outs.append(jnp.dot(p.astype(MXU_DTYPE), vh, preferred_element_type=jnp.float32))
    # single full-width (lane-dense) store
    o_ref[0] = jnp.concatenate(outs, axis=-1).astype(o_ref.dtype)


# ----------------------------------------------------------------------------
# Pallas wrappers (row-tiled grids, "parallel" semantics)
# ----------------------------------------------------------------------------
def linear(x2d, w, b, activation=None):
    # TODO(synk): for very large N (vocab) / K add an N/K-tiled accumulator grid
    #             (f32 VMEM scratch + pl.when init/finalize); whole-weight blocks
    #             are fine at these sizes and the v7x 64 MiB VMEM budget.
    m, kdim = x2d.shape
    n = w.shape[1]
    tm = _row_tile(m)
    return pl.pallas_call(
        functools.partial(_linear_kernel, activation=activation),
        out_shape=jax.ShapeDtypeStruct((m, n), ACT_DTYPE),
        grid=(m // tm,),
        in_specs=[
            pl.BlockSpec((tm, kdim), lambda i: (i, 0)),
            pl.BlockSpec((kdim, n), lambda i: (0, 0)),
            pl.BlockSpec((1, n), lambda i: (0, 0)),
        ],
        out_specs=pl.BlockSpec((tm, n), lambda i: (i, 0)),
        compiler_params=_parallel(),
    )(x2d, w, b.reshape(1, n))


def linear_split(x2d, w, b, n_out):
    """One matmul against a concatenated weight, returning n_out (M, D) outputs."""
    m, kdim = x2d.shape
    n = w.shape[1]
    d_out = n // n_out
    tm = _row_tile(m)
    return pl.pallas_call(
        _linear_split_kernel,
        out_shape=tuple(jax.ShapeDtypeStruct((m, d_out), ACT_DTYPE) for _ in range(n_out)),
        grid=(m // tm,),
        in_specs=[
            pl.BlockSpec((tm, kdim), lambda i: (i, 0)),
            pl.BlockSpec((kdim, n), lambda i: (0, 0)),
            pl.BlockSpec((1, n), lambda i: (0, 0)),
        ],
        out_specs=tuple(pl.BlockSpec((tm, d_out), lambda i: (i, 0)) for _ in range(n_out)),
        compiler_params=_parallel(),
    )(x2d, w, b.reshape(1, n))


def proj_add_ln(ctx2d, res2d, w, b, g, beta):
    m, d = ctx2d.shape
    tm = _row_tile(m)
    return pl.pallas_call(
        _proj_add_ln_kernel,
        out_shape=jax.ShapeDtypeStruct((m, d), ACT_DTYPE),
        grid=(m // tm,),
        in_specs=[
            pl.BlockSpec((tm, d), lambda i: (i, 0)),
            pl.BlockSpec((tm, d), lambda i: (i, 0)),
            pl.BlockSpec((d, d), lambda i: (0, 0)),
            pl.BlockSpec((1, d), lambda i: (0, 0)),
            pl.BlockSpec((1, d), lambda i: (0, 0)),
            pl.BlockSpec((1, d), lambda i: (0, 0)),
        ],
        out_specs=pl.BlockSpec((tm, d), lambda i: (i, 0)),
        compiler_params=_parallel(),
    )(ctx2d, res2d, w, b.reshape(1, d), g.reshape(1, d), beta.reshape(1, d))


def ffn_add_ln(x2d, w1, b1, w2, b2, g, beta):
    m, d = x2d.shape
    f = w1.shape[1]
    tm = _row_tile(m)
    return pl.pallas_call(
        _ffn_add_ln_kernel,
        out_shape=jax.ShapeDtypeStruct((m, d), ACT_DTYPE),
        grid=(m // tm,),
        in_specs=[
            pl.BlockSpec((tm, d), lambda i: (i, 0)),
            pl.BlockSpec((d, f), lambda i: (0, 0)),
            pl.BlockSpec((1, f), lambda i: (0, 0)),
            pl.BlockSpec((f, d), lambda i: (0, 0)),
            pl.BlockSpec((1, d), lambda i: (0, 0)),
            pl.BlockSpec((1, d), lambda i: (0, 0)),
            pl.BlockSpec((1, d), lambda i: (0, 0)),
        ],
        out_specs=pl.BlockSpec((tm, d), lambda i: (i, 0)),
        compiler_params=_parallel(),
    )(x2d, w1, b1.reshape(1, f), w2, b2.reshape(1, d), g.reshape(1, d), beta.reshape(1, d))


def mha(q, k, v, *, num_heads, causal):
    b, sq, d = q.shape
    sk = k.shape[1]
    scale = 1.0 / math.sqrt(d // num_heads)
    return pl.pallas_call(
        functools.partial(_mha_kernel, num_heads=num_heads, scale=scale, causal=causal),
        out_shape=jax.ShapeDtypeStruct((b, sq, d), ACT_DTYPE),
        grid=(b,),
        in_specs=[
            pl.BlockSpec((1, sq, d), lambda i: (i, 0, 0)),
            pl.BlockSpec((1, sk, d), lambda i: (i, 0, 0)),
            pl.BlockSpec((1, sk, d), lambda i: (i, 0, 0)),
        ],
        out_specs=pl.BlockSpec((1, sq, d), lambda i: (i, 0, 0)),
        compiler_params=_parallel(),
    )(q, k, v)


# ----------------------------------------------------------------------------
# Transformer building blocks
# ----------------------------------------------------------------------------
def self_attention_block(x2d, batch, seq, p, ln_g, ln_b, num_heads, causal):
    d = x2d.shape[1]
    q2, k2, v2 = linear_split(x2d, p["w_qkv"], p["b_qkv"], 3)
    ctx = mha(q2.reshape(batch, seq, d), k2.reshape(batch, seq, d),
              v2.reshape(batch, seq, d), num_heads=num_heads, causal=causal)
    return proj_add_ln(ctx.reshape(batch * seq, d), x2d, p["wo"], p["bo"], ln_g, ln_b)


def cross_attention_block(y2d, enc2d, batch, s_tgt, s_src, p, ln_g, ln_b, num_heads):
    d = y2d.shape[1]
    q2 = linear(y2d, p["wq"], p["bq"])
    k2, v2 = linear_split(enc2d, p["w_kv"], p["b_kv"], 2)
    ctx = mha(q2.reshape(batch, s_tgt, d), k2.reshape(batch, s_src, d),
              v2.reshape(batch, s_src, d), num_heads=num_heads, causal=False)
    return proj_add_ln(ctx.reshape(batch * s_tgt, d), y2d, p["wo"], p["bo"], ln_g, ln_b)


def transformer_forward(params, src, tgt, *, num_heads):
    batch, s_src = src.shape
    _, s_tgt = tgt.shape
    d = params["pe"].shape[1]
    pe = params["pe"]

    # Encoder (src_mask in the reference is all-unmasked -> no mask path)
    x = (params["src_emb"][src] + pe[None, :s_src, :]).reshape(batch * s_src, d)
    for lyr in params["enc_layers"]:
        x = self_attention_block(x, batch, s_src, lyr["attn"], lyr["ln1_g"], lyr["ln1_b"],
                                 num_heads, causal=False)
        x = ffn_add_ln(x, lyr["ff1_w"], lyr["ff1_b"], lyr["ff2_w"], lyr["ff2_b"],
                       lyr["ln2_g"], lyr["ln2_b"])
    enc = x

    # Decoder (causal self-attention, unmasked cross-attention)
    y = (params["tgt_emb"][tgt] + pe[None, :s_tgt, :]).reshape(batch * s_tgt, d)
    for lyr in params["dec_layers"]:
        y = self_attention_block(y, batch, s_tgt, lyr["self_attn"], lyr["ln1_g"], lyr["ln1_b"],
                                 num_heads, causal=True)
        y = cross_attention_block(y, enc, batch, s_tgt, s_src, lyr["cross_attn"],
                                  lyr["ln2_g"], lyr["ln2_b"], num_heads)
        y = ffn_add_ln(y, lyr["ff1_w"], lyr["ff1_b"], lyr["ff2_w"], lyr["ff2_b"],
                       lyr["ln3_g"], lyr["ln3_b"])

    # Final projection to tgt vocab
    out = linear(y, params["fc_w"], params["fc_b"])
    return out.reshape(batch, s_tgt, -1)


# ----------------------------------------------------------------------------
# Deterministic parameter init
# ----------------------------------------------------------------------------
def sinusoidal_pe(max_len, d):
    pos = jnp.arange(max_len, dtype=jnp.float32)[:, None]
    i = jnp.arange(d, dtype=jnp.float32)[None, :]
    angle = pos / jnp.power(10000.0, (2.0 * jnp.floor(i / 2.0)) / d)
    return jnp.where(jnp.arange(d)[None, :] % 2 == 0, jnp.sin(angle), jnp.cos(angle))


def init_params(key, src_vocab, tgt_vocab, d, ff_dim, num_layers, max_length):
    keys = iter(jax.random.split(key, 128))

    def dense(i, o, dtype=MXU_DTYPE):
        return (jax.random.normal(next(keys), (i, o), jnp.float32) * 0.02).astype(dtype)

    def self_attn_params():
        return dict(
            w_qkv=dense(d, 3 * d), b_qkv=jnp.zeros((3 * d,), jnp.float32),
            wo=dense(d, d), bo=jnp.zeros((d,), jnp.float32),
        )

    def cross_attn_params():
        return dict(
            wq=dense(d, d), bq=jnp.zeros((d,), jnp.float32),
            w_kv=dense(d, 2 * d), b_kv=jnp.zeros((2 * d,), jnp.float32),
            wo=dense(d, d), bo=jnp.zeros((d,), jnp.float32),
        )

    def ffn_ln(extra_ln=False):
        p = dict(
            ff1_w=dense(d, ff_dim), ff1_b=jnp.zeros((ff_dim,), jnp.float32),
            ff2_w=dense(ff_dim, d), ff2_b=jnp.zeros((d,), jnp.float32),
            ln1_g=jnp.ones((d,), jnp.float32), ln1_b=jnp.zeros((d,), jnp.float32),
            ln2_g=jnp.ones((d,), jnp.float32), ln2_b=jnp.zeros((d,), jnp.float32),
        )
        if extra_ln:
            p["ln3_g"] = jnp.ones((d,), jnp.float32)
            p["ln3_b"] = jnp.zeros((d,), jnp.float32)
        return p

    enc_layers = []
    for _ in range(num_layers):
        lyr = dict(attn=self_attn_params())
        lyr.update(ffn_ln())
        enc_layers.append(lyr)

    dec_layers = []
    for _ in range(num_layers):
        lyr = dict(self_attn=self_attn_params(), cross_attn=cross_attn_params())
        lyr.update(ffn_ln(extra_ln=True))
        dec_layers.append(lyr)

    return dict(
        src_emb=dense(src_vocab, d, jnp.float32),
        tgt_emb=dense(tgt_vocab, d, jnp.float32),
        pe=sinusoidal_pe(max_length, d).astype(jnp.float32),
        enc_layers=enc_layers,
        dec_layers=dec_layers,
        fc_w=dense(d, tgt_vocab),
        fc_b=jnp.zeros((tgt_vocab,), jnp.float32),
    )


# ----------------------------------------------------------------------------
if __name__ == "__main__":
    # Small, forward-consistent configuration
    src_vocab_size = 50
    tgt_vocab_size = 60
    embed_dim = 32
    max_length = 16
    num_layers = 2
    num_heads = 4
    ff_dim = 64

    B, S_src, S_tgt = 2, 8, 8

    key = jax.random.PRNGKey(0)
    k_params, k_src, k_tgt = jax.random.split(key, 3)

    params = init_params(
        k_params, src_vocab_size, tgt_vocab_size, embed_dim, ff_dim, num_layers, max_length
    )
    src = jax.random.randint(k_src, (B, S_src), 0, src_vocab_size, dtype=jnp.int32)
    tgt = jax.random.randint(k_tgt, (B, S_tgt), 0, tgt_vocab_size, dtype=jnp.int32)

    fwd = jax.jit(functools.partial(transformer_forward, num_heads=num_heads))
    out = fwd(params, src, tgt)
    jax.block_until_ready(out)

    assert out.shape == (B, S_tgt, tgt_vocab_size), out.shape
    assert out.dtype == jnp.float32
    assert bool(jnp.all(jnp.isfinite(out)))
    print("KERNEL_OK")
</pallas_src>

<mosaic_0001>
module attributes {stable_mosaic.version = 11 : i64} {
  func.func @_linear_split_kernel(%arg0: i32, %arg1: memref<16x32xf32, #tpu.memory_space<vmem>>, %arg2: memref<32x96xbf16, #tpu.memory_space<vmem>>, %arg3: memref<1x96xf32, #tpu.memory_space<vmem>>, %arg4: memref<16x32xf32, #tpu.memory_space<vmem>>, %arg5: memref<16x32xf32, #tpu.memory_space<vmem>>, %arg6: memref<16x32xf32, #tpu.memory_space<vmem>>) attributes {dimension_semantics = [#tpu.dimension_semantics<parallel>], iteration_bounds = array<i64: 1>, scalar_prefetch = 0 : i64, scratch_operands = 0 : i64, tpu.core_type = #tpu.core_type<tc>, window_params = [{transform_indices = @transform_0, window_bounds = array<i64: 16, 32>}, {pipeline_mode = #tpu.pipeline_mode<synchronous>, transform_indices = @transform_1, window_bounds = array<i64: 32, 96>}, {pipeline_mode = #tpu.pipeline_mode<synchronous>, transform_indices = @transform_2, window_bounds = array<i64: 1, 96>}, {transform_indices = @transform_3, window_bounds = array<i64: 16, 32>}, {transform_indices = @transform_4, window_bounds = array<i64: 16, 32>}, {transform_indices = @transform_5, window_bounds = array<i64: 16, 32>}]} {
    %c0 = arith.constant 0 : index
    %c0_0 = arith.constant 0 : index
    %0 = vector.load %arg1[%c0, %c0_0] : memref<16x32xf32, #tpu.memory_space<vmem>>, vector<16x32xf32>
    %1 = arith.truncf %0 : vector<16x32xf32> to vector<16x32xbf16>
    %c0_1 = arith.constant 0 : index
    %c0_2 = arith.constant 0 : index
    %2 = vector.load %arg2[%c0_1, %c0_2] : memref<32x96xbf16, #tpu.memory_space<vmem>>, vector<32x96xbf16>
    %cst = arith.constant dense<0.000000e+00> : vector<16x96xf32>
    %3 = tpu.matmul %1, %2, %cst {dimension_numbers = #tpu.dot_dimension_numbers<[1], [0], [0], [1], [0, 0, 1, 1], [], []>} : vector<16x32xbf16>, vector<32x96xbf16>, vector<16x96xf32> -> vector<16x96xf32>
    %c0_3 = arith.constant 0 : index
    %c0_4 = arith.constant 0 : index
    %4 = vector.load %arg3[%c0_3, %c0_4] : memref<1x96xf32, #tpu.memory_space<vmem>>, vector<1x96xf32>
    %5 = vector.broadcast %4 : vector<1x96xf32> to vector<16x96xf32>
    %6 = arith.addf %3, %5 : vector<16x96xf32>
    %7 = vector.extract_strided_slice %6 {offsets = [0, 0], sizes = [16, 32], strides = [1, 1]} : vector<16x96xf32> to vector<16x32xf32>
    %c0_5 = arith.constant 0 : index
    %c0_6 = arith.constant 0 : index
    %8 = vector.load %arg4[%c0_5, %c0_6] : memref<16x32xf32, #tpu.memory_space<vmem>>, vector<16x32xf32>
    tpu.vector_store %arg4[%c0_5, %c0_6], %7 {strides = array<i32>} : memref<16x32xf32, #tpu.memory_space<vmem>>, vector<16x32xf32>,
    %9 = vector.extract_strided_slice %6 {offsets = [0, 32], sizes = [16, 32], strides = [1, 1]} : vector<16x96xf32> to vector<16x32xf32>
    %c0_7 = arith.constant 0 : index
    %c0_8 = arith.constant 0 : index
    %10 = vector.load %arg5[%c0_7, %c0_8] : memref<16x32xf32, #tpu.memory_space<vmem>>, vector<16x32xf32>
    tpu.vector_store %arg5[%c0_7, %c0_8], %9 {strides = array<i32>} : memref<16x32xf32, #tpu.memory_space<vmem>>, vector<16x32xf32>,
    %11 = vector.extract_strided_slice %6 {offsets = [0, 64], sizes = [16, 32], strides = [1, 1]} : vector<16x96xf32> to vector<16x32xf32>
    %c0_9 = arith.constant 0 : index
    %c0_10 = arith.constant 0 : index
    %12 = vector.load %arg6[%c0_9, %c0_10] : memref<16x32xf32, #tpu.memory_space<vmem>>, vector<16x32xf32>
    tpu.vector_store %arg6[%c0_9, %c0_10], %11 {strides = array<i32>} : memref<16x32xf32, #tpu.memory_space<vmem>>, vector<16x32xf32>,
    return
  }
  func.func @transform_0(%arg0: i32) -> (i32, i32) {
    %c0_i32 = arith.constant 0 : i32
    %c0_i32_0 = arith.constant 0 : i32
    return %arg0, %c0_i32 : i32, i32
  }
  func.func @transform_1(%arg0: i32) -> (i32, i32) {
    %c0_i32 = arith.constant 0 : i32
    %c0_i32_0 = arith.constant 0 : i32
    %c0_i32_1 = arith.constant 0 : i32
    return %c0_i32, %c0_i32_0 : i32, i32
  }
  func.func @transform_2(%arg0: i32) -> (i32, i32) {
    %c0_i32 = arith.constant 0 : i32
    %c0_i32_0 = arith.constant 0 : i32
    %c0_i32_1 = arith.constant 0 : i32
    return %c0_i32, %c0_i32_0 : i32, i32
  }
  func.func @transform_3(%arg0: i32) -> (i32, i32) {
    %c0_i32 = arith.constant 0 : i32
    %c0_i32_0 = arith.constant 0 : i32
    return %arg0, %c0_i32 : i32, i32
  }
  func.func @transform_4(%arg0: i32) -> (i32, i32) {
    %c0_i32 = arith.constant 0 : i32
    %c0_i32_0 = arith.constant 0 : i32
    return %arg0, %c0_i32 : i32, i32
  }
  func.func @transform_5(%arg0: i32) -> (i32, i32) {
    %c0_i32 = arith.constant 0 : i32
    %c0_i32_0 = arith.constant 0 : i32
    return %arg0, %c0_i32 : i32, i32
  }
}

module attributes {stable_mosaic.version = 11 : i64} {
  func.func @_mha_kernel(%arg0: i32, %arg1: memref<1x8x32xf32, #tpu.memory_space<vmem>>, %arg2: memref<1x8x32xf32, #tpu.memory_space<vmem>>, %arg3: memref<1x8x32xf32, #tpu.memory_space<vmem>>, %arg4: memref<1x8x32xf32, #tpu.memory_space<vmem>>) attributes {dimension_semantics = [#tpu.dimension_semantics<parallel>], iteration_bounds = array<i64: 2>, scalar_prefetch = 0 : i64, scratch_operands = 0 : i64, tpu.core_type = #tpu.core_type<tc>, window_params = [{transform_indices = @transform_0, window_bounds = array<i64: 1, 8, 32>}, {transform_indices = @transform_1, window_bounds = array<i64: 1, 8, 32>}, {transform_indices = @transform_2, window_bounds = array<i64: 1, 8, 32>}, {transform_indices = @transform_3, window_bounds = array<i64: 1, 8, 32>}]} {
    %c0 = arith.constant 0 : index
    %c0_0 = arith.constant 0 : index
    %c0_1 = arith.constant 0 : index
    %0 = vector.load %arg1[%c0, %c0_0, %c0_1] : memref<1x8x32xf32, #tpu.memory_space<vmem>>, vector<1x8x32xf32>
    %1 = vector.shape_cast %0 : vector<1x8x32xf32> to vector<8x32xf32>
    %cst = arith.constant 0.353553385 : f32
    %2 = vector.broadcast %cst : f32 to vector<8x32xf32>
    %3 = arith.mulf %1, %2 : vector<8x32xf32>
    %c0_2 = arith.constant 0 : index
    %c0_3 = arith.constant 0 : index
    %c0_4 = arith.constant 0 : index
    %4 = vector.load %arg2[%c0_2, %c0_3, %c0_4] : memref<1x8x32xf32, #tpu.memory_space<vmem>>, vector<1x8x32xf32>
    %5 = vector.shape_cast %4 : vector<1x8x32xf32> to vector<8x32xf32>
    %c0_5 = arith.constant 0 : index
    %c0_6 = arith.constant 0 : index
    %c0_7 = arith.constant 0 : index
    %6 = vector.load %arg3[%c0_5, %c0_6, %c0_7] : memref<1x8x32xf32, #tpu.memory_space<vmem>>, vector<1x8x32xf32>
    %7 = vector.shape_cast %6 : vector<1x8x32xf32> to vector<8x32xf32>
    %8 = tpu.iota {dimensions = array<i32: 0>} : vector<8x8xi32>
    %9 = tpu.iota {dimensions = array<i32: 1>} : vector<8x8xi32>
    %10 = arith.cmpi sle, %9, %8 : vector<8x8xi32>
    %11 = vector.extract_strided_slice %3 {offsets = [0, 0], sizes = [8, 8], strides = [1, 1]} : vector<8x32xf32> to vector<8x8xf32>
    %12 = arith.truncf %11 : vector<8x8xf32> to vector<8x8xbf16>
    %13 = vector.extract_strided_slice %5 {offsets = [0, 0], sizes = [8, 8], strides = [1, 1]} : vector<8x32xf32> to vector<8x8xf32>
    %14 = arith.truncf %13 : vector<8x8xf32> to vector<8x8xbf16>
    %15 = vector.extract_strided_slice %7 {offsets = [0, 0], sizes = [8, 8], strides = [1, 1]} : vector<8x32xf32> to vector<8x8xf32>
    %16 = arith.truncf %15 : vector<8x8xf32> to vector<8x8xbf16>
    %17 = tpu.transpose %14, [1, 0] : vector<8x8xbf16> -> vector<8x8xbf16>
    %cst_8 = arith.constant dense<0.000000e+00> : vector<8x8xf32>
    %18 = tpu.matmul %12, %17, %cst_8 {dimension_numbers = #tpu.dot_dimension_numbers<[1], [0], [0], [1], [0, 0, 1, 1], [], []>} : vector<8x8xbf16>, vector<8x8xbf16>, vector<8x8xf32> -> vector<8x8xf32>
    %cst_9 = arith.constant -1.000000e+30 : f32
    %19 = vector.broadcast %cst_9 : f32 to vector<8x8xf32>
    %20 = arith.select %10, %18, %19 : vector<8x8xi1>, vector<8x8xf32>
    %cst_10 = arith.constant dense<0xFF800000> : vector<8xf32>
    %21 = vector.multi_reduction <maximumf>, %20, %cst_10 [1] : vector<8x8xf32> to vector<8xf32>
    %22 = vector.shape_cast %21 : vector<8xf32> to vector<8x1xf32>
    %23 = vector.broadcast %22 : vector<8x1xf32> to vector<8x8xf32>
    %24 = arith.subf %20, %23 : vector<8x8xf32>
    %25 = math.exp %24 : vector<8x8xf32>
    %cst_11 = arith.constant dense<0.000000e+00> : vector<8xf32>
    %26 = vector.multi_reduction <add>, %25, %cst_11 [1] : vector<8x8xf32> to vector<8xf32>
    %27 = vector.shape_cast %26 : vector<8xf32> to vector<8x1xf32>
    %28 = tpu.reciprocal %27 {approx = true} : vector<8x1xf32> -> vector<8x1xf32>
    %29 = vector.broadcast %28 : vector<8x1xf32> to vector<8x8xf32>
    %30 = arith.mulf %25, %29 : vector<8x8xf32>
    %31 = arith.truncf %30 : vector<8x8xf32> to vector<8x8xbf16>
    %cst_12 = arith.constant dense<0.000000e+00> : vector<8x8xf32>
    %32 = tpu.matmul %31, %16, %cst_12 {dimension_numbers = #tpu.dot_dimension_numbers<[1], [0], [0], [1], [0, 0, 1, 1], [], []>} : vector<8x8xbf16>, vector<8x8xbf16>, vector<8x8xf32> -> vector<8x8xf32>
    %33 = vector.extract_strided_slice %3 {offsets = [0, 8], sizes = [8, 8], strides = [1, 1]} : vector<8x32xf32> to vector<8x8xf32>
    %34 = arith.truncf %33 : vector<8x8xf32> to vector<8x8xbf16>
    %35 = vector.extract_strided_slice %5 {offsets = [0, 8], sizes = [8, 8], strides = [1, 1]} : vector<8x32xf32> to vector<8x8xf32>
    %36 = arith.truncf %35 : vector<8x8xf32> to vector<8x8xbf16>
    %37 = vector.extract_strided_slice %7 {offsets = [0, 8], sizes = [8, 8], strides = [1, 1]} : vector<8x32xf32> to vector<8x8xf32>
    %38 = arith.truncf %37 : vector<8x8xf32> to vector<8x8xbf16>
    %39 = tpu.transpose %36, [1, 0] : vector<8x8xbf16> -> vector<8x8xbf16>
    %cst_13 = arith.constant dense<0.000000e+00> : vector<8x8xf32>
    %40 = tpu.matmul %34, %39, %cst_13 {dimension_numbers = #tpu.dot_dimension_numbers<[1], [0], [0], [1], [0, 0, 1, 1], [], []>} : vector<8x8xbf16>, vector<8x8xbf16>, vector<8x8xf32> -> vector<8x8xf32>
    %cst_14 = arith.constant -1.000000e+30 : f32
    %41 = vector.broadcast %cst_14 : f32 to vector<8x8xf32>
    %42 = arith.select %10, %40, %41 : vector<8x8xi1>, vector<8x8xf32>
    %cst_15 = arith.constant dense<0xFF800000> : vector<8xf32>
    %43 = vector.multi_reduction <maximumf>, %42, %cst_15 [1] : vector<8x8xf32> to vector<8xf32>
    %44 = vector.shape_cast %43 : vector<8xf32> to vector<8x1xf32>
    %45 = vector.broadcast %44 : vector<8x1xf32> to vector<8x8xf32>
    %46 = arith.subf %42, %45 : vector<8x8xf32>
    %47 = math.exp %46 : vector<8x8xf32>
    %cst_16 = arith.constant dense<0.000000e+00> : vector<8xf32>
    %48 = vector.multi_reduction <add>, %47, %cst_16 [1] : vector<8x8xf32> to vector<8xf32>
    %49 = vector.shape_cast %48 : vector<8xf32> to vector<8x1xf32>
    %50 = tpu.reciprocal %49 {approx = true} : vector<8x1xf32> -> vector<8x1xf32>
    %51 = vector.broadcast %50 : vector<8x1xf32> to vector<8x8xf32>
    %52 = arith.mulf %47, %51 : vector<8x8xf32>
    %53 = arith.truncf %52 : vector<8x8xf32> to vector<8x8xbf16>
    %cst_17 = arith.constant dense<0.000000e+00> : vector<8x8xf32>
    %54 = tpu.matmul %53, %38, %cst_17 {dimension_numbers = #tpu.dot_dimension_numbers<[1], [0], [0], [1], [0, 0, 1, 1], [], []>} : vector<8x8xbf16>, vector<8x8xbf16>, vector<8x8xf32> -> vector<8x8xf32>
    %55 = vector.extract_strided_slice %3 {offsets = [0, 16], sizes = [8, 8], strides = [1, 1]} : vector<8x32xf32> to vector<8x8xf32>
    %56 = arith.truncf %55 : vector<8x8xf32> to vector<8x8xbf16>
    %57 = vector.extract_strided_slice %5 {offsets = [0, 16], sizes = [8, 8], strides = [1, 1]} : vector<8x32xf32> to vector<8x8xf32>
    %58 = arith.truncf %57 : vector<8x8xf32> to vector<8x8xbf16>
    %59 = vector.extract_strided_slice %7 {offsets = [0, 16], sizes = [8, 8], strides = [1, 1]} : vector<8x32xf32> to vector<8x8xf32>
    %60 = arith.truncf %59 : vector<8x8xf32> to vector<8x8xbf16>
    %61 = tpu.transpose %58, [1, 0] : vector<8x8xbf16> -> vector<8x8xbf16>
    %cst_18 = arith.constant dense<0.000000e+00> : vector<8x8xf32>
    %62 = tpu.matmul %56, %61, %cst_18 {dimension_numbers = #tpu.dot_dimension_numbers<[1], [0], [0], [1], [0, 0, 1, 1], [], []>} : vector<8x8xbf16>, vector<8x8xbf16>, vector<8x8xf32> -> vector<8x8xf32>
    %cst_19 = arith.constant -1.000000e+30 : f32
    %63 = vector.broadcast %cst_19 : f32 to vector<8x8xf32>
    %64 = arith.select %10, %62, %63 : vector<8x8xi1>, vector<8x8xf32>
    %cst_20 = arith.constant dense<0xFF800000> : vector<8xf32>
    %65 = vector.multi_reduction <maximumf>, %64, %cst_20 [1] : vector<8x8xf32> to vector<8xf32>
    %66 = vector.shape_cast %65 : vector<8xf32> to vector<8x1xf32>
    %67 = vector.broadcast %66 : vector<8x1xf32> to vector<8x8xf32>
    %68 = arith.subf %64, %67 : vector<8x8xf32>
    %69 = math.exp %68 : vector<8x8xf32>
    %cst_21 = arith.constant dense<0.000000e+00> : vector<8xf32>
    %70 = vector.multi_reduction <add>, %69, %cst_21 [1] : vector<8x8xf32> to vector<8xf32>
    %71 = vector.shape_cast %70 : vector<8xf32> to vector<8x1xf32>
    %72 = tpu.reciprocal %71 {approx = true} : vector<8x1xf32> -> vector<8x1xf32>
    %73 = vector.broadcast %72 : vector<8x1xf32> to vector<8x8xf32>
    %74 = arith.mulf %69, %73 : vector<8x8xf32>
    %75 = arith.truncf %74 : vector<8x8xf32> to vector<8x8xbf16>
    %cst_22 = arith.constant dense<0.000000e+00> : vector<8x8xf32>
    %76 = tpu.matmul %75, %60, %cst_22 {dimension_numbers = #tpu.dot_dimension_numbers<[1], [0], [0], [1], [0, 0, 1, 1], [], []>} : vector<8x8xbf16>, vector<8x8xbf16>, vector<8x8xf32> -> vector<8x8xf32>
    %77 = vector.extract_strided_slice %3 {offsets = [0, 24], sizes = [8, 8], strides = [1, 1]} : vector<8x32xf32> to vector<8x8xf32>
    %78 = arith.truncf %77 : vector<8x8xf32> to vector<8x8xbf16>
    %79 = vector.extract_strided_slice %5 {offsets = [0, 24], sizes = [8, 8], strides = [1, 1]} : vector<8x32xf32> to vector<8x8xf32>
    %80 = arith.truncf %79 : vector<8x8xf32> to vector<8x8xbf16>
    %81 = vector.extract_strided_slice %7 {offsets = [0, 24], sizes = [8, 8], strides = [1, 1]} : vector<8x32xf32> to vector<8x8xf32>
    %82 = arith.truncf %81 : vector<8x8xf32> to vector<8x8xbf16>
    %83 = tpu.transpose %80, [1, 0] : vector<8x8xbf16> -> vector<8x8xbf16>
    %cst_23 = arith.constant dense<0.000000e+00> : vector<8x8xf32>
    %84 = tpu.matmul %78, %83, %cst_23 {dimension_numbers = #tpu.dot_dimension_numbers<[1], [0], [0], [1], [0, 0, 1, 1], [], []>} : vector<8x8xbf16>, vector<8x8xbf16>, vector<8x8xf32> -> vector<8x8xf32>
    %cst_24 = arith.constant -1.000000e+30 : f32
    %85 = vector.broadcast %cst_24 : f32 to vector<8x8xf32>
    %86 = arith.select %10, %84, %85 : vector<8x8xi1>, vector<8x8xf32>
    %cst_25 = arith.constant dense<0xFF800000> : vector<8xf32>
    %87 = vector.multi_reduction <maximumf>, %86, %cst_25 [1] : vector<8x8xf32> to vector<8xf32>
    %88 = vector.shape_cast %87 : vector<8xf32> to vector<8x1xf32>
    %89 = vector.broadcast %88 : vector<8x1xf32> to vector<8x8xf32>
    %90 = arith.subf %86, %89 : vector<8x8xf32>
    %91 = math.exp %90 : vector<8x8xf32>
    %cst_26 = arith.constant dense<0.000000e+00> : vector<8xf32>
    %92 = vector.multi_reduction <add>, %91, %cst_26 [1] : vector<8x8xf32> to vector<8xf32>
    %93 = vector.shape_cast %92 : vector<8xf32> to vector<8x1xf32>
    %94 = tpu.reciprocal %93 {approx = true} : vector<8x1xf32> -> vector<8x1xf32>
    %95 = vector.broadcast %94 : vector<8x1xf32> to vector<8x8xf32>
    %96 = arith.mulf %91, %95 : vector<8x8xf32>
    %97 = arith.truncf %96 : vector<8x8xf32> to vector<8x8xbf16>
    %cst_27 = arith.constant dense<0.000000e+00> : vector<8x8xf32>
    %98 = tpu.matmul %97, %82, %cst_27 {dimension_numbers = #tpu.dot_dimension_numbers<[1], [0], [0], [1], [0, 0, 1, 1], [], []>} : vector<8x8xbf16>, vector<8x8xbf16>, vector<8x8xf32> -> vector<8x8xf32>
    %99 = tpu.concatenate %32, %54, %76, %98 in 1 : vector<8x8xf32>, vector<8x8xf32>, vector<8x8xf32>, vector<8x8xf32> -> vector<8x32xf32>
    %c0_28 = arith.constant 0 : index
    %c0_29 = arith.constant 0 : index
    %c0_30 = arith.constant 0 : index
    %100 = vector.load %arg4[%c0_28, %c0_29, %c0_30] : memref<1x8x32xf32, #tpu.memory_space<vmem>>, vector<1x8x32xf32>
    %101 = vector.shape_cast %100 : vector<1x8x32xf32> to vector<8x32xf32>
    %102 = vector.shape_cast %99 : vector<8x32xf32> to vector<1x8x32xf32>
    tpu.vector_store %arg4[%c0_28, %c0_29, %c0_30], %102 {strides = array<i32>} : memref<1x8x32xf32, #tpu.memory_space<vmem>>, vector<1x8x32xf32>,
    return
  }
  func.func @transform_0(%arg0: i32) -> (i32, i32, i32) {
    %c0_i32 = arith.constant 0 : i32
    %c0_i32_0 = arith.constant 0 : i32
    %c0_i32_1 = arith.constant 0 : i32
    return %arg0, %c0_i32, %c0_i32_0 : i32, i32, i32
  }
  func.func @transform_1(%arg0: i32) -> (i32, i32, i32) {
    %c0_i32 = arith.constant 0 : i32
    %c0_i32_0 = arith.constant 0 : i32
    %c0_i32_1 = arith.constant 0 : i32
    return %arg0, %c0_i32, %c0_i32_0 : i32, i32, i32
  }
  func.func @transform_2(%arg0: i32) -> (i32, i32, i32) {
    %c0_i32 = arith.constant 0 : i32
    %c0_i32_0 = arith.constant 0 : i32
    %c0_i32_1 = arith.constant 0 : i32
    return %arg0, %c0_i32, %c0_i32_0 : i32, i32, i32
  }
  func.func @transform_3(%arg0: i32) -> (i32, i32, i32) {
    %c0_i32 = arith.constant 0 : i32
    %c0_i32_0 = arith.constant 0 : i32
    %c0_i32_1 = arith.constant 0 : i32
    return %arg0, %c0_i32, %c0_i32_0 : i32, i32, i32
  }
}

module attributes {stable_mosaic.version = 11 : i64} {
  func.func @_linear_kernel(%arg0: i32, %arg1: memref<16x32xf32, #tpu.memory_space<vmem>>, %arg2: memref<32x32xbf16, #tpu.memory_space<vmem>>, %arg3: memref<1x32xf32, #tpu.memory_space<vmem>>, %arg4: memref<16x32xf32, #tpu.memory_space<vmem>>) attributes {dimension_semantics = [#tpu.dimension_semantics<parallel>], iteration_bounds = array<i64: 1>, scalar_prefetch = 0 : i64, scratch_operands = 0 : i64, tpu.core_type = #tpu.core_type<tc>, window_params = [{transform_indices = @transform_0, window_bounds = array<i64: 16, 32>}, {pipeline_mode = #tpu.pipeline_mode<synchronous>, transform_indices = @transform_1, window_bounds = array<i64: 32, 32>}, {pipeline_mode = #tpu.pipeline_mode<synchronous>, transform_indices = @transform_2, window_bounds = array<i64: 1, 32>}, {transform_indices = @transform_3, window_bounds = array<i64: 16, 32>}]} {
    %c0 = arith.constant 0 : index
    %c0_0 = arith.constant 0 : index
    %0 = vector.load %arg1[%c0, %c0_0] : memref<16x32xf32, #tpu.memory_space<vmem>>, vector<16x32xf32>
    %1 = arith.truncf %0 : vector<16x32xf32> to vector<16x32xbf16>
    %c0_1 = arith.constant 0 : index
    %c0_2 = arith.constant 0 : index
    %2 = vector.load %arg2[%c0_1, %c0_2] : memref<32x32xbf16, #tpu.memory_space<vmem>>, vector<32x32xbf16>
    %cst = arith.constant dense<0.000000e+00> : vector<16x32xf32>
    %3 = tpu.matmul %1, %2, %cst {dimension_numbers = #tpu.dot_dimension_numbers<[1], [0], [0], [1], [0, 0, 1, 1], [], []>} : vector<16x32xbf16>, vector<32x32xbf16>, vector<16x32xf32> -> vector<16x32xf32>
    %c0_3 = arith.constant 0 : index
    %c0_4 = arith.constant 0 : index
    %4 = vector.load %arg3[%c0_3, %c0_4] : memref<1x32xf32, #tpu.memory_space<vmem>>, vector<1x32xf32>
    %5 = vector.broadcast %4 : vector<1x32xf32> to vector<16x32xf32>
    %6 = arith.addf %3, %5 : vector<16x32xf32>
    %c0_5 = arith.constant 0 : index
    %c0_6 = arith.constant 0 : index
    %7 = vector.load %arg4[%c0_5, %c0_6] : memref<16x32xf32, #tpu.memory_space<vmem>>, vector<16x32xf32>
    tpu.vector_store %arg4[%c0_5, %c0_6], %6 {strides = array<i32>} : memref<16x32xf32, #tpu.memory_space<vmem>>, vector<16x32xf32>,
    return
  }
  func.func @transform_0(%arg0: i32) -> (i32, i32) {
    %c0_i32 = arith.constant 0 : i32
    %c0_i32_0 = arith.constant 0 : i32
    return %arg0, %c0_i32 : i32, i32
  }
  func.func @transform_1(%arg0: i32) -> (i32, i32) {
    %c0_i32 = arith.constant 0 : i32
    %c0_i32_0 = arith.constant 0 : i32
    %c0_i32_1 = arith.constant 0 : i32
    return %c0_i32, %c0_i32_0 : i32, i32
  }
  func.func @transform_2(%arg0: i32) -> (i32, i32) {
    %c0_i32 = arith.constant 0 : i32
    %c0_i32_0 = arith.constant 0 : i32
    %c0_i32_1 = arith.constant 0 : i32
    return %c0_i32, %c0_i32_0 : i32, i32
  }
  func.func @transform_3(%arg0: i32) -> (i32, i32) {
    %c0_i32 = arith.constant 0 : i32
    %c0_i32_0 = arith.constant 0 : i32
    return %arg0, %c0_i32 : i32, i32
  }
}

module attributes {stable_mosaic.version = 11 : i64} {
  func.func @_proj_add_ln_kernel(%arg0: i32, %arg1: memref<16x32xf32, #tpu.memory_space<vmem>>, %arg2: memref<16x32xf32, #tpu.memory_space<vmem>>, %arg3: memref<32x32xbf16, #tpu.memory_space<vmem>>, %arg4: memref<1x32xf32, #tpu.memory_space<vmem>>, %arg5: memref<1x32xf32, #tpu.memory_space<vmem>>, %arg6: memref<1x32xf32, #tpu.memory_space<vmem>>, %arg7: memref<16x32xf32, #tpu.memory_space<vmem>>) attributes {dimension_semantics = [#tpu.dimension_semantics<parallel>], iteration_bounds = array<i64: 1>, scalar_prefetch = 0 : i64, scratch_operands = 0 : i64, tpu.core_type = #tpu.core_type<tc>, window_params = [{transform_indices = @transform_0, window_bounds = array<i64: 16, 32>}, {transform_indices = @transform_1, window_bounds = array<i64: 16, 32>}, {pipeline_mode = #tpu.pipeline_mode<synchronous>, transform_indices = @transform_2, window_bounds = array<i64: 32, 32>}, {pipeline_mode = #tpu.pipeline_mode<synchronous>, transform_indices = @transform_3, window_bounds = array<i64: 1, 32>}, {pipeline_mode = #tpu.pipeline_mode<synchronous>, transform_indices = @transform_4, window_bounds = array<i64: 1, 32>}, {pipeline_mode = #tpu.pipeline_mode<synchronous>, transform_indices = @transform_5, window_bounds = array<i64: 1, 32>}, {transform_indices = @transform_6, window_bounds = array<i64: 16, 32>}]} {
    %c0 = arith.constant 0 : index
    %c0_0 = arith.constant 0 : index
    %0 = vector.load %arg1[%c0, %c0_0] : memref<16x32xf32, #tpu.memory_space<vmem>>, vector<16x32xf32>
    %1 = arith.truncf %0 : vector<16x32xf32> to vector<16x32xbf16>
    %c0_1 = arith.constant 0 : index
    %c0_2 = arith.constant 0 : index
    %2 = vector.load %arg3[%c0_1, %c0_2] : memref<32x32xbf16, #tpu.memory_space<vmem>>, vector<32x32xbf16>
    %cst = arith.constant dense<0.000000e+00> : vector<16x32xf32>
    %3 = tpu.matmul %1, %2, %cst {dimension_numbers = #tpu.dot_dimension_numbers<[1], [0], [0], [1], [0, 0, 1, 1], [], []>} : vector<16x32xbf16>, vector<32x32xbf16>, vector<16x32xf32> -> vector<16x32xf32>
    %c0_3 = arith.constant 0 : index
    %c0_4 = arith.constant 0 : index
    %4 = vector.load %arg4[%c0_3, %c0_4] : memref<1x32xf32, #tpu.memory_space<vmem>>, vector<1x32xf32>
    %5 = vector.broadcast %4 : vector<1x32xf32> to vector<16x32xf32>
    %6 = arith.addf %3, %5 : vector<16x32xf32>
    %c0_5 = arith.constant 0 : index
    %c0_6 = arith.constant 0 : index
    %7 = vector.load %arg2[%c0_5, %c0_6] : memref<16x32xf32, #tpu.memory_space<vmem>>, vector<16x32xf32>
    %8 = arith.addf %7, %6 : vector<16x32xf32>
    %c0_7 = arith.constant 0 : index
    %c0_8 = arith.constant 0 : index
    %9 = vector.load %arg5[%c0_7, %c0_8] : memref<1x32xf32, #tpu.memory_space<vmem>>, vector<1x32xf32>
    %c0_9 = arith.constant 0 : index
    %c0_10 = arith.constant 0 : index
    %10 = vector.load %arg6[%c0_9, %c0_10] : memref<1x32xf32, #tpu.memory_space<vmem>>, vector<1x32xf32>
    %cst_11 = arith.constant dense<0.000000e+00> : vector<16xf32>
    %11 = vector.multi_reduction <add>, %8, %cst_11 [1] : vector<16x32xf32> to vector<16xf32>
    %12 = vector.shape_cast %11 : vector<16xf32> to vector<16x1xf32>
    %cst_12 = arith.constant 3.200000e+01 : f32
    %13 = vector.broadcast %cst_12 : f32 to vector<16x1xf32>
    %14 = arith.divf %12, %13 : vector<16x1xf32>
    %15 = vector.broadcast %14 : vector<16x1xf32> to vector<16x32xf32>
    %16 = arith.subf %8, %15 : vector<16x32xf32>
    %17 = arith.mulf %16, %16 : vector<16x32xf32>
    %cst_13 = arith.constant dense<0.000000e+00> : vector<16xf32>
    %18 = vector.multi_reduction <add>, %17, %cst_13 [1] : vector<16x32xf32> to vector<16xf32>
    %19 = vector.shape_cast %18 : vector<16xf32> to vector<16x1xf32>
    %cst_14 = arith.constant 3.200000e+01 : f32
    %20 = vector.broadcast %cst_14 : f32 to vector<16x1xf32>
    %21 = arith.divf %19, %20 : vector<16x1xf32>
    %22 = vector.broadcast %14 : vector<16x1xf32> to vector<16x32xf32>
    %23 = arith.subf %8, %22 : vector<16x32xf32>
    %cst_15 = arith.constant 9.99999974E-6 : f32
    %24 = vector.broadcast %cst_15 : f32 to vector<16x1xf32>
    %25 = arith.addf %21, %24 : vector<16x1xf32>
    %26 = math.rsqrt %25 : vector<16x1xf32>
    %27 = vector.broadcast %26 : vector<16x1xf32> to vector<16x32xf32>
    %28 = arith.mulf %23, %27 : vector<16x32xf32>
    %29 = vector.broadcast %9 : vector<1x32xf32> to vector<16x32xf32>
    %30 = arith.mulf %28, %29 : vector<16x32xf32>
    %31 = vector.broadcast %10 : vector<1x32xf32> to vector<16x32xf32>
    %32 = arith.addf %30, %31 : vector<16x32xf32>
    %c0_16 = arith.constant 0 : index
    %c0_17 = arith.constant 0 : index
    %33 = vector.load %arg7[%c0_16, %c0_17] : memref<16x32xf32, #tpu.memory_space<vmem>>, vector<16x32xf32>
    tpu.vector_store %arg7[%c0_16, %c0_17], %32 {strides = array<i32>} : memref<16x32xf32, #tpu.memory_space<vmem>>, vector<16x32xf32>,
    return
  }
  func.func @transform_0(%arg0: i32) -> (i32, i32) {
    %c0_i32 = arith.constant 0 : i32
    %c0_i32_0 = arith.constant 0 : i32
    return %arg0, %c0_i32 : i32, i32
  }
  func.func @transform_1(%arg0: i32) -> (i32, i32) {
    %c0_i32 = arith.constant 0 : i32
    %c0_i32_0 = arith.constant 0 : i32
    return %arg0, %c0_i32 : i32, i32
  }
  func.func @transform_2(%arg0: i32) -> (i32, i32) {
    %c0_i32 = arith.constant 0 : i32
    %c0_i32_0 = arith.constant 0 : i32
    %c0_i32_1 = arith.constant 0 : i32
    return %c0_i32, %c0_i32_0 : i32, i32
  }
  func.func @transform_3(%arg0: i32) -> (i32, i32) {
    %c0_i32 = arith.constant 0 : i32
    %c0_i32_0 = arith.constant 0 : i32
    %c0_i32_1 = arith.constant 0 : i32
    return %c0_i32, %c0_i32_0 : i32, i32
  }
  func.func @transform_4(%arg0: i32) -> (i32, i32) {
    %c0_i32 = arith.constant 0 : i32
    %c0_i32_0 = arith.constant 0 : i32
    %c0_i32_1 = arith.constant 0 : i32
    return %c0_i32, %c0_i32_0 : i32, i32
  }
  func.func @transform_5(%arg0: i32) -> (i32, i32) {
    %c0_i32 = arith.constant 0 : i32
    %c0_i32_0 = arith.constant 0 : i32
    %c0_i32_1 = arith.constant 0 : i32
    return %c0_i32, %c0_i32_0 : i32, i32
  }
  func.func @transform_6(%arg0: i32) -> (i32, i32) {
    %c0_i32 = arith.constant 0 : i32
    %c0_i32_0 = arith.constant 0 : i32
    return %arg0, %c0_i32 : i32, i32
  }
}

module attributes {stable_mosaic.version = 11 : i64} {
  func.func @_mha_kernel(%arg0: i32, %arg1: memref<1x8x32xf32, #tpu.memory_space<vmem>>, %arg2: memref<1x8x32xf32, #tpu.memory_space<vmem>>, %arg3: memref<1x8x32xf32, #tpu.memory_space<vmem>>, %arg4: memref<1x8x32xf32, #tpu.memory_space<vmem>>) attributes {dimension_semantics = [#tpu.dimension_semantics<parallel>], iteration_bounds = array<i64: 2>, scalar_prefetch = 0 : i64, scratch_operands = 0 : i64, tpu.core_type = #tpu.core_type<tc>, window_params = [{transform_indices = @transform_0, window_bounds = array<i64: 1, 8, 32>}, {transform_indices = @transform_1, window_bounds = array<i64: 1, 8, 32>}, {transform_indices = @transform_2, window_bounds = array<i64: 1, 8, 32>}, {transform_indices = @transform_3, window_bounds = array<i64: 1, 8, 32>}]} {
    %c0 = arith.constant 0 : index
    %c0_0 = arith.constant 0 : index
    %c0_1 = arith.constant 0 : index
    %0 = vector.load %arg1[%c0, %c0_0, %c0_1] : memref<1x8x32xf32, #tpu.memory_space<vmem>>, vector<1x8x32xf32>
    %1 = vector.shape_cast %0 : vector<1x8x32xf32> to vector<8x32xf32>
    %cst = arith.constant 0.353553385 : f32
    %2 = vector.broadcast %cst : f32 to vector<8x32xf32>
    %3 = arith.mulf %1, %2 : vector<8x32xf32>
    %c0_2 = arith.constant 0 : index
    %c0_3 = arith.constant 0 : index
    %c0_4 = arith.constant 0 : index
    %4 = vector.load %arg2[%c0_2, %c0_3, %c0_4] : memref<1x8x32xf32, #tpu.memory_space<vmem>>, vector<1x8x32xf32>
    %5 = vector.shape_cast %4 : vector<1x8x32xf32> to vector<8x32xf32>
    %c0_5 = arith.constant 0 : index
    %c0_6 = arith.constant 0 : index
    %c0_7 = arith.constant 0 : index
    %6 = vector.load %arg3[%c0_5, %c0_6, %c0_7] : memref<1x8x32xf32, #tpu.memory_space<vmem>>, vector<1x8x32xf32>
    %7 = vector.shape_cast %6 : vector<1x8x32xf32> to vector<8x32xf32>
    %8 = vector.extract_strided_slice %3 {offsets = [0, 0], sizes = [8, 8], strides = [1, 1]} : vector<8x32xf32> to vector<8x8xf32>
    %9 = arith.truncf %8 : vector<8x8xf32> to vector<8x8xbf16>
    %10 = vector.extract_strided_slice %5 {offsets = [0, 0], sizes = [8, 8], strides = [1, 1]} : vector<8x32xf32> to vector<8x8xf32>
    %11 = arith.truncf %10 : vector<8x8xf32> to vector<8x8xbf16>
    %12 = vector.extract_strided_slice %7 {offsets = [0, 0], sizes = [8, 8], strides = [1, 1]} : vector<8x32xf32> to vector<8x8xf32>
    %13 = arith.truncf %12 : vector<8x8xf32> to vector<8x8xbf16>
    %14 = tpu.transpose %11, [1, 0] : vector<8x8xbf16> -> vector<8x8xbf16>
    %cst_8 = arith.constant dense<0.000000e+00> : vector<8x8xf32>
    %15 = tpu.matmul %9, %14, %cst_8 {dimension_numbers = #tpu.dot_dimension_numbers<[1], [0], [0], [1], [0, 0, 1, 1], [], []>} : vector<8x8xbf16>, vector<8x8xbf16>, vector<8x8xf32> -> vector<8x8xf32>
    %cst_9 = arith.constant dense<0xFF800000> : vector<8xf32>
    %16 = vector.multi_reduction <maximumf>, %15, %cst_9 [1] : vector<8x8xf32> to vector<8xf32>
    %17 = vector.shape_cast %16 : vector<8xf32> to vector<8x1xf32>
    %18 = vector.broadcast %17 : vector<8x1xf32> to vector<8x8xf32>
    %19 = arith.subf %15, %18 : vector<8x8xf32>
    %20 = math.exp %19 : vector<8x8xf32>
    %cst_10 = arith.constant dense<0.000000e+00> : vector<8xf32>
    %21 = vector.multi_reduction <add>, %20, %cst_10 [1] : vector<8x8xf32> to vector<8xf32>
    %22 = vector.shape_cast %21 : vector<8xf32> to vector<8x1xf32>
    %23 = tpu.reciprocal %22 {approx = true} : vector<8x1xf32> -> vector<8x1xf32>
    %24 = vector.broadcast %23 : vector<8x1xf32> to vector<8x8xf32>
    %25 = arith.mulf %20, %24 : vector<8x8xf32>
    %26 = arith.truncf %25 : vector<8x8xf32> to vector<8x8xbf16>
    %cst_11 = arith.constant dense<0.000000e+00> : vector<8x8xf32>
    %27 = tpu.matmul %26, %13, %cst_11 {dimension_numbers = #tpu.dot_dimension_numbers<[1], [0], [0], [1], [0, 0, 1, 1], [], []>} : vector<8x8xbf16>, vector<8x8xbf16>, vector<8x8xf32> -> vector<8x8xf32>
    %28 = vector.extract_strided_slice %3 {offsets = [0, 8], sizes = [8, 8], strides = [1, 1]} : vector<8x32xf32> to vector<8x8xf32>
    %29 = arith.truncf %28 : vector<8x8xf32> to vector<8x8xbf16>
    %30 = vector.extract_strided_slice %5 {offsets = [0, 8], sizes = [8, 8], strides = [1, 1]} : vector<8x32xf32> to vector<8x8xf32>
    %31 = arith.truncf %30 : vector<8x8xf32> to vector<8x8xbf16>
    %32 = vector.extract_strided_slice %7 {offsets = [0, 8], sizes = [8, 8], strides = [1, 1]} : vector<8x32xf32> to vector<8x8xf32>
    %33 = arith.truncf %32 : vector<8x8xf32> to vector<8x8xbf16>
    %34 = tpu.transpose %31, [1, 0] : vector<8x8xbf16> -> vector<8x8xbf16>
    %cst_12 = arith.constant dense<0.000000e+00> : vector<8x8xf32>
    %35 = tpu.matmul %29, %34, %cst_12 {dimension_numbers = #tpu.dot_dimension_numbers<[1], [0], [0], [1], [0, 0, 1, 1], [], []>} : vector<8x8xbf16>, vector<8x8xbf16>, vector<8x8xf32> -> vector<8x8xf32>
    %cst_13 = arith.constant dense<0xFF800000> : vector<8xf32>
    %36 = vector.multi_reduction <maximumf>, %35, %cst_13 [1] : vector<8x8xf32> to vector<8xf32>
    %37 = vector.shape_cast %36 : vector<8xf32> to vector<8x1xf32>
    %38 = vector.broadcast %37 : vector<8x1xf32> to vector<8x8xf32>
    %39 = arith.subf %35, %38 : vector<8x8xf32>
    %40 = math.exp %39 : vector<8x8xf32>
    %cst_14 = arith.constant dense<0.000000e+00> : vector<8xf32>
    %41 = vector.multi_reduction <add>, %40, %cst_14 [1] : vector<8x8xf32> to vector<8xf32>
    %42 = vector.shape_cast %41 : vector<8xf32> to vector<8x1xf32>
    %43 = tpu.reciprocal %42 {approx = true} : vector<8x1xf32> -> vector<8x1xf32>
    %44 = vector.broadcast %43 : vector<8x1xf32> to vector<8x8xf32>
    %45 = arith.mulf %40, %44 : vector<8x8xf32>
    %46 = arith.truncf %45 : vector<8x8xf32> to vector<8x8xbf16>
    %cst_15 = arith.constant dense<0.000000e+00> : vector<8x8xf32>
    %47 = tpu.matmul %46, %33, %cst_15 {dimension_numbers = #tpu.dot_dimension_numbers<[1], [0], [0], [1], [0, 0, 1, 1], [], []>} : vector<8x8xbf16>, vector<8x8xbf16>, vector<8x8xf32> -> vector<8x8xf32>
    %48 = vector.extract_strided_slice %3 {offsets = [0, 16], sizes = [8, 8], strides = [1, 1]} : vector<8x32xf32> to vector<8x8xf32>
    %49 = arith.truncf %48 : vector<8x8xf32> to vector<8x8xbf16>
    %50 = vector.extract_strided_slice %5 {offsets = [0, 16], sizes = [8, 8], strides = [1, 1]} : vector<8x32xf32> to vector<8x8xf32>
    %51 = arith.truncf %50 : vector<8x8xf32> to vector<8x8xbf16>
    %52 = vector.extract_strided_slice %7 {offsets = [0, 16], sizes = [8, 8], strides = [1, 1]} : vector<8x32xf32> to vector<8x8xf32>
    %53 = arith.truncf %52 : vector<8x8xf32> to vector<8x8xbf16>
    %54 = tpu.transpose %51, [1, 0] : vector<8x8xbf16> -> vector<8x8xbf16>
    %cst_16 = arith.constant dense<0.000000e+00> : vector<8x8xf32>
    %55 = tpu.matmul %49, %54, %cst_16 {dimension_numbers = #tpu.dot_dimension_numbers<[1], [0], [0], [1], [0, 0, 1, 1], [], []>} : vector<8x8xbf16>, vector<8x8xbf16>, vector<8x8xf32> -> vector<8x8xf32>
    %cst_17 = arith.constant dense<0xFF800000> : vector<8xf32>
    %56 = vector.multi_reduction <maximumf>, %55, %cst_17 [1] : vector<8x8xf32> to vector<8xf32>
    %57 = vector.shape_cast %56 : vector<8xf32> to vector<8x1xf32>
    %58 = vector.broadcast %57 : vector<8x1xf32> to vector<8x8xf32>
    %59 = arith.subf %55, %58 : vector<8x8xf32>
    %60 = math.exp %59 : vector<8x8xf32>
    %cst_18 = arith.constant dense<0.000000e+00> : vector<8xf32>
    %61 = vector.multi_reduction <add>, %60, %cst_18 [1] : vector<8x8xf32> to vector<8xf32>
    %62 = vector.shape_cast %61 : vector<8xf32> to vector<8x1xf32>
    %63 = tpu.reciprocal %62 {approx = true} : vector<8x1xf32> -> vector<8x1xf32>
    %64 = vector.broadcast %63 : vector<8x1xf32> to vector<8x8xf32>
    %65 = arith.mulf %60, %64 : vector<8x8xf32>
    %66 = arith.truncf %65 : vector<8x8xf32> to vector<8x8xbf16>
    %cst_19 = arith.constant dense<0.000000e+00> : vector<8x8xf32>
    %67 = tpu.matmul %66, %53, %cst_19 {dimension_numbers = #tpu.dot_dimension_numbers<[1], [0], [0], [1], [0, 0, 1, 1], [], []>} : vector<8x8xbf16>, vector<8x8xbf16>, vector<8x8xf32> -> vector<8x8xf32>
    %68 = vector.extract_strided_slice %3 {offsets = [0, 24], sizes = [8, 8], strides = [1, 1]} : vector<8x32xf32> to vector<8x8xf32>
    %69 = arith.truncf %68 : vector<8x8xf32> to vector<8x8xbf16>
    %70 = vector.extract_strided_slice %5 {offsets = [0, 24], sizes = [8, 8], strides = [1, 1]} : vector<8x32xf32> to vector<8x8xf32>
    %71 = arith.truncf %70 : vector<8x8xf32> to vector<8x8xbf16>
    %72 = vector.extract_strided_slice %7 {offsets = [0, 24], sizes = [8, 8], strides = [1, 1]} : vector<8x32xf32> to vector<8x8xf32>
    %73 = arith.truncf %72 : vector<8x8xf32> to vector<8x8xbf16>
    %74 = tpu.transpose %71, [1, 0] : vector<8x8xbf16> -> vector<8x8xbf16>
    %cst_20 = arith.constant dense<0.000000e+00> : vector<8x8xf32>
    %75 = tpu.matmul %69, %74, %cst_20 {dimension_numbers = #tpu.dot_dimension_numbers<[1], [0], [0], [1], [0, 0, 1, 1], [], []>} : vector<8x8xbf16>, vector<8x8xbf16>, vector<8x8xf32> -> vector<8x8xf32>
    %cst_21 = arith.constant dense<0xFF800000> : vector<8xf32>
    %76 = vector.multi_reduction <maximumf>, %75, %cst_21 [1] : vector<8x8xf32> to vector<8xf32>
    %77 = vector.shape_cast %76 : vector<8xf32> to vector<8x1xf32>
    %78 = vector.broadcast %77 : vector<8x1xf32> to vector<8x8xf32>
    %79 = arith.subf %75, %78 : vector<8x8xf32>
    %80 = math.exp %79 : vector<8x8xf32>
    %cst_22 = arith.constant dense<0.000000e+00> : vector<8xf32>
    %81 = vector.multi_reduction <add>, %80, %cst_22 [1] : vector<8x8xf32> to vector<8xf32>
    %82 = vector.shape_cast %81 : vector<8xf32> to vector<8x1xf32>
    %83 = tpu.reciprocal %82 {approx = true} : vector<8x1xf32> -> vector<8x1xf32>
    %84 = vector.broadcast %83 : vector<8x1xf32> to vector<8x8xf32>
    %85 = arith.mulf %80, %84 : vector<8x8xf32>
    %86 = arith.truncf %85 : vector<8x8xf32> to vector<8x8xbf16>
    %cst_23 = arith.constant dense<0.000000e+00> : vector<8x8xf32>
    %87 = tpu.matmul %86, %73, %cst_23 {dimension_numbers = #tpu.dot_dimension_numbers<[1], [0], [0], [1], [0, 0, 1, 1], [], []>} : vector<8x8xbf16>, vector<8x8xbf16>, vector<8x8xf32> -> vector<8x8xf32>
    %88 = tpu.concatenate %27, %47, %67, %87 in 1 : vector<8x8xf32>, vector<8x8xf32>, vector<8x8xf32>, vector<8x8xf32> -> vector<8x32xf32>
    %c0_24 = arith.constant 0 : index
    %c0_25 = arith.constant 0 : index
    %c0_26 = arith.constant 0 : index
    %89 = vector.load %arg4[%c0_24, %c0_25, %c0_26] : memref<1x8x32xf32, #tpu.memory_space<vmem>>, vector<1x8x32xf32>
    %90 = vector.shape_cast %89 : vector<1x8x32xf32> to vector<8x32xf32>
    %91 = vector.shape_cast %88 : vector<8x32xf32> to vector<1x8x32xf32>
    tpu.vector_store %arg4[%c0_24, %c0_25, %c0_26], %91 {strides = array<i32>} : memref<1x8x32xf32, #tpu.memory_space<vmem>>, vector<1x8x32xf32>,
    return
  }
  func.func @transform_0(%arg0: i32) -> (i32, i32, i32) {
    %c0_i32 = arith.constant 0 : i32
    %c0_i32_0 = arith.constant 0 : i32
    %c0_i32_1 = arith.constant 0 : i32
    return %arg0, %c0_i32, %c0_i32_0 : i32, i32, i32
  }
  func.func @transform_1(%arg0: i32) -> (i32, i32, i32) {
    %c0_i32 = arith.constant 0 : i32
    %c0_i32_0 = arith.constant 0 : i32
    %c0_i32_1 = arith.constant 0 : i32
    return %arg0, %c0_i32, %c0_i32_0 : i32, i32, i32
  }
  func.func @transform_2(%arg0: i32) -> (i32, i32, i32) {
    %c0_i32 = arith.constant 0 : i32
    %c0_i32_0 = arith.constant 0 : i32
    %c0_i32_1 = arith.constant 0 : i32
    return %arg0, %c0_i32, %c0_i32_0 : i32, i32, i32
  }
  func.func @transform_3(%arg0: i32) -> (i32, i32, i32) {
    %c0_i32 = arith.constant 0 : i32
    %c0_i32_0 = arith.constant 0 : i32
    %c0_i32_1 = arith.constant 0 : i32
    return %arg0, %c0_i32, %c0_i32_0 : i32, i32, i32
  }
}

module attributes {stable_mosaic.version = 11 : i64} {
  func.func @_linear_split_kernel(%arg0: i32, %arg1: memref<16x32xf32, #tpu.memory_space<vmem>>, %arg2: memref<32x64xbf16, #tpu.memory_space<vmem>>, %arg3: memref<1x64xf32, #tpu.memory_space<vmem>>, %arg4: memref<16x32xf32, #tpu.memory_space<vmem>>, %arg5: memref<16x32xf32, #tpu.memory_space<vmem>>) attributes {dimension_semantics = [#tpu.dimension_semantics<parallel>], iteration_bounds = array<i64: 1>, scalar_prefetch = 0 : i64, scratch_operands = 0 : i64, tpu.core_type = #tpu.core_type<tc>, window_params = [{transform_indices = @transform_0, window_bounds = array<i64: 16, 32>}, {pipeline_mode = #tpu.pipeline_mode<synchronous>, transform_indices = @transform_1, window_bounds = array<i64: 32, 64>}, {pipeline_mode = #tpu.pipeline_mode<synchronous>, transform_indices = @transform_2, window_bounds = array<i64: 1, 64>}, {transform_indices = @transform_3, window_bounds = array<i64: 16, 32>}, {transform_indices = @transform_4, window_bounds = array<i64: 16, 32>}]} {
    %c0 = arith.constant 0 : index
    %c0_0 = arith.constant 0 : index
    %0 = vector.load %arg1[%c0, %c0_0] : memref<16x32xf32, #tpu.memory_space<vmem>>, vector<16x32xf32>
    %1 = arith.truncf %0 : vector<16x32xf32> to vector<16x32xbf16>
    %c0_1 = arith.constant 0 : index
    %c0_2 = arith.constant 0 : index
    %2 = vector.load %arg2[%c0_1, %c0_2] : memref<32x64xbf16, #tpu.memory_space<vmem>>, vector<32x64xbf16>
    %cst = arith.constant dense<0.000000e+00> : vector<16x64xf32>
    %3 = tpu.matmul %1, %2, %cst {dimension_numbers = #tpu.dot_dimension_numbers<[1], [0], [0], [1], [0, 0, 1, 1], [], []>} : vector<16x32xbf16>, vector<32x64xbf16>, vector<16x64xf32> -> vector<16x64xf32>
    %c0_3 = arith.constant 0 : index
    %c0_4 = arith.constant 0 : index
    %4 = vector.load %arg3[%c0_3, %c0_4] : memref<1x64xf32, #tpu.memory_space<vmem>>, vector<1x64xf32>
    %5 = vector.broadcast %4 : vector<1x64xf32> to vector<16x64xf32>
    %6 = arith.addf %3, %5 : vector<16x64xf32>
    %7 = vector.extract_strided_slice %6 {offsets = [0, 0], sizes = [16, 32], strides = [1, 1]} : vector<16x64xf32> to vector<16x32xf32>
    %c0_5 = arith.constant 0 : index
    %c0_6 = arith.constant 0 : index
    %8 = vector.load %arg4[%c0_5, %c0_6] : memref<16x32xf32, #tpu.memory_space<vmem>>, vector<16x32xf32>
    tpu.vector_store %arg4[%c0_5, %c0_6], %7 {strides = array<i32>} : memref<16x32xf32, #tpu.memory_space<vmem>>, vector<16x32xf32>,
    %9 = vector.extract_strided_slice %6 {offsets = [0, 32], sizes = [16, 32], strides = [1, 1]} : vector<16x64xf32> to vector<16x32xf32>
    %c0_7 = arith.constant 0 : index
    %c0_8 = arith.constant 0 : index
    %10 = vector.load %arg5[%c0_7, %c0_8] : memref<16x32xf32, #tpu.memory_space<vmem>>, vector<16x32xf32>
    tpu.vector_store %arg5[%c0_7, %c0_8], %9 {strides = array<i32>} : memref<16x32xf32, #tpu.memory_space<vmem>>, vector<16x32xf32>,
    return
  }
  func.func @transform_0(%arg0: i32) -> (i32, i32) {
    %c0_i32 = arith.constant 0 : i32
    %c0_i32_0 = arith.constant 0 : i32
    return %arg0, %c0_i32 : i32, i32
  }
  func.func @transform_1(%arg0: i32) -> (i32, i32) {
    %c0_i32 = arith.constant 0 : i32
    %c0_i32_0 = arith.constant 0 : i32
    %c0_i32_1 = arith.constant 0 : i32
    return %c0_i32, %c0_i32_0 : i32, i32
  }
  func.func @transform_2(%arg0: i32) -> (i32, i32) {
    %c0_i32 = arith.constant 0 : i32
    %c0_i32_0 = arith.constant 0 : i32
    %c0_i32_1 = arith.constant 0 : i32
    return %c0_i32, %c0_i32_0 : i32, i32
  }
  func.func @transform_3(%arg0: i32) -> (i32, i32) {
    %c0_i32 = arith.constant 0 : i32
    %c0_i32_0 = arith.constant 0 : i32
    return %arg0, %c0_i32 : i32, i32
  }
  func.func @transform_4(%arg0: i32) -> (i32, i32) {
    %c0_i32 = arith.constant 0 : i32
    %c0_i32_0 = arith.constant 0 : i32
    return %arg0, %c0_i32 : i32, i32
  }
}

module attributes {stable_mosaic.version = 11 : i64} {
  func.func @_linear_kernel(%arg0: i32, %arg1: memref<16x32xf32, #tpu.memory_space<vmem>>, %arg2: memref<32x60xbf16, #tpu.memory_space<vmem>>, %arg3: memref<1x60xf32, #tpu.memory_space<vmem>>, %arg4: memref<16x60xf32, #tpu.memory_space<vmem>>) attributes {dimension_semantics = [#tpu.dimension_semantics<parallel>], iteration_bounds = array<i64: 1>, scalar_prefetch = 0 : i64, scratch_operands = 0 : i64, tpu.core_type = #tpu.core_type<tc>, window_params = [{transform_indices = @transform_0, window_bounds = array<i64: 16, 32>}, {pipeline_mode = #tpu.pipeline_mode<synchronous>, transform_indices = @transform_1, window_bounds = array<i64: 32, 60>}, {pipeline_mode = #tpu.pipeline_mode<synchronous>, transform_indices = @transform_2, window_bounds = array<i64: 1, 60>}, {transform_indices = @transform_3, window_bounds = array<i64: 16, 60>}]} {
    %c0 = arith.constant 0 : index
    %c0_0 = arith.constant 0 : index
    %0 = vector.load %arg1[%c0, %c0_0] : memref<16x32xf32, #tpu.memory_space<vmem>>, vector<16x32xf32>
    %1 = arith.truncf %0 : vector<16x32xf32> to vector<16x32xbf16>
    %c0_1 = arith.constant 0 : index
    %c0_2 = arith.constant 0 : index
    %2 = vector.load %arg2[%c0_1, %c0_2] : memref<32x60xbf16, #tpu.memory_space<vmem>>, vector<32x60xbf16>
    %cst = arith.constant dense<0.000000e+00> : vector<16x60xf32>
    %3 = tpu.matmul %1, %2, %cst {dimension_numbers = #tpu.dot_dimension_numbers<[1], [0], [0], [1], [0, 0, 1, 1], [], []>} : vector<16x32xbf16>, vector<32x60xbf16>, vector<16x60xf32> -> vector<16x60xf32>
    %c0_3 = arith.constant 0 : index
    %c0_4 = arith.constant 0 : index
    %4 = vector.load %arg3[%c0_3, %c0_4] : memref<1x60xf32, #tpu.memory_space<vmem>>, vector<1x60xf32>
    %5 = vector.broadcast %4 : vector<1x60xf32> to vector<16x60xf32>
    %6 = arith.addf %3, %5 : vector<16x60xf32>
    %c0_5 = arith.constant 0 : index
    %c0_6 = arith.constant 0 : index
    %7 = vector.load %arg4[%c0_5, %c0_6] : memref<16x60xf32, #tpu.memory_space<vmem>>, vector<16x60xf32>
    tpu.vector_store %arg4[%c0_5, %c0_6], %6 {strides = array<i32>} : memref<16x60xf32, #tpu.memory_space<vmem>>, vector<16x60xf32>,
    return
  }
  func.func @transform_0(%arg0: i32) -> (i32, i32) {
    %c0_i32 = arith.constant 0 : i32
    %c0_i32_0 = arith.constant 0 : i32
    return %arg0, %c0_i32 : i32, i32
  }
  func.func @transform_1(%arg0: i32) -> (i32, i32) {
    %c0_i32 = arith.constant 0 : i32
    %c0_i32_0 = arith.constant 0 : i32
    %c0_i32_1 = arith.constant 0 : i32
    return %c0_i32, %c0_i32_0 : i32, i32
  }
  func.func @transform_2(%arg0: i32) -> (i32, i32) {
    %c0_i32 = arith.constant 0 : i32
    %c0_i32_0 = arith.constant 0 : i32
    %c0_i32_1 = arith.constant 0 : i32
    return %c0_i32, %c0_i32_0 : i32, i32
  }
  func.func @transform_3(%arg0: i32) -> (i32, i32) {
    %c0_i32 = arith.constant 0 : i32
    %c0_i32_0 = arith.constant 0 : i32
    return %arg0, %c0_i32 : i32, i32
  }
}

module attributes {stable_mosaic.version = 11 : i64} {
  func.func @_ffn_add_ln_kernel(%arg0: i32, %arg1: memref<16x32xf32, #tpu.memory_space<vmem>>, %arg2: memref<32x64xbf16, #tpu.memory_space<vmem>>, %arg3: memref<1x64xf32, #tpu.memory_space<vmem>>, %arg4: memref<64x32xbf16, #tpu.memory_space<vmem>>, %arg5: memref<1x32xf32, #tpu.memory_space<vmem>>, %arg6: memref<1x32xf32, #tpu.memory_space<vmem>>, %arg7: memref<1x32xf32, #tpu.memory_space<vmem>>, %arg8: memref<16x32xf32, #tpu.memory_space<vmem>>) attributes {dimension_semantics = [#tpu.dimension_semantics<parallel>], iteration_bounds = array<i64: 1>, scalar_prefetch = 0 : i64, scratch_operands = 0 : i64, tpu.core_type = #tpu.core_type<tc>, window_params = [{transform_indices = @transform_0, window_bounds = array<i64: 16, 32>}, {pipeline_mode = #tpu.pipeline_mode<synchronous>, transform_indices = @transform_1, window_bounds = array<i64: 32, 64>}, {pipeline_mode = #tpu.pipeline_mode<synchronous>, transform_indices = @transform_2, window_bounds = array<i64: 1, 64>}, {pipeline_mode = #tpu.pipeline_mode<synchronous>, transform_indices = @transform_3, window_bounds = array<i64: 64, 32>}, {pipeline_mode = #tpu.pipeline_mode<synchronous>, transform_indices = @transform_4, window_bounds = array<i64: 1, 32>}, {pipeline_mode = #tpu.pipeline_mode<synchronous>, transform_indices = @transform_5, window_bounds = array<i64: 1, 32>}, {pipeline_mode = #tpu.pipeline_mode<synchronous>, transform_indices = @transform_6, window_bounds = array<i64: 1, 32>}, {transform_indices = @transform_7, window_bounds = array<i64: 16, 32>}]} {
    %c0 = arith.constant 0 : index
    %c0_0 = arith.constant 0 : index
    %0 = vector.load %arg1[%c0, %c0_0] : memref<16x32xf32, #tpu.memory_space<vmem>>, vector<16x32xf32>
    %1 = arith.truncf %0 : vector<16x32xf32> to vector<16x32xbf16>
    %c0_1 = arith.constant 0 : index
    %c0_2 = arith.constant 0 : index
    %2 = vector.load %arg2[%c0_1, %c0_2] : memref<32x64xbf16, #tpu.memory_space<vmem>>, vector<32x64xbf16>
    %cst = arith.constant dense<0.000000e+00> : vector<16x64xf32>
    %3 = tpu.matmul %1, %2, %cst {dimension_numbers = #tpu.dot_dimension_numbers<[1], [0], [0], [1], [0, 0, 1, 1], [], []>} : vector<16x32xbf16>, vector<32x64xbf16>, vector<16x64xf32> -> vector<16x64xf32>
    %c0_3 = arith.constant 0 : index
    %c0_4 = arith.constant 0 : index
    %4 = vector.load %arg3[%c0_3, %c0_4] : memref<1x64xf32, #tpu.memory_space<vmem>>, vector<1x64xf32>
    %5 = vector.broadcast %4 : vector<1x64xf32> to vector<16x64xf32>
    %6 = arith.addf %3, %5 : vector<16x64xf32>
    %cst_5 = arith.constant 0.000000e+00 : f32
    %7 = vector.broadcast %cst_5 : f32 to vector<16x64xf32>
    %8 = arith.maximumf %6, %7 : vector<16x64xf32>
    %9 = arith.truncf %8 : vector<16x64xf32> to vector<16x64xbf16>
    %c0_6 = arith.constant 0 : index
    %c0_7 = arith.constant 0 : index
    %10 = vector.load %arg4[%c0_6, %c0_7] : memref<64x32xbf16, #tpu.memory_space<vmem>>, vector<64x32xbf16>
    %cst_8 = arith.constant dense<0.000000e+00> : vector<16x32xf32>
    %11 = tpu.matmul %9, %10, %cst_8 {dimension_numbers = #tpu.dot_dimension_numbers<[1], [0], [0], [1], [0, 0, 1, 1], [], []>} : vector<16x64xbf16>, vector<64x32xbf16>, vector<16x32xf32> -> vector<16x32xf32>
    %c0_9 = arith.constant 0 : index
    %c0_10 = arith.constant 0 : index
    %12 = vector.load %arg5[%c0_9, %c0_10] : memref<1x32xf32, #tpu.memory_space<vmem>>, vector<1x32xf32>
    %13 = vector.broadcast %12 : vector<1x32xf32> to vector<16x32xf32>
    %14 = arith.addf %11, %13 : vector<16x32xf32>
    %15 = arith.addf %0, %14 : vector<16x32xf32>
    %c0_11 = arith.constant 0 : index
    %c0_12 = arith.constant 0 : index
    %16 = vector.load %arg6[%c0_11, %c0_12] : memref<1x32xf32, #tpu.memory_space<vmem>>, vector<1x32xf32>
    %c0_13 = arith.constant 0 : index
    %c0_14 = arith.constant 0 : index
    %17 = vector.load %arg7[%c0_13, %c0_14] : memref<1x32xf32, #tpu.memory_space<vmem>>, vector<1x32xf32>
    %cst_15 = arith.constant dense<0.000000e+00> : vector<16xf32>
    %18 = vector.multi_reduction <add>, %15, %cst_15 [1] : vector<16x32xf32> to vector<16xf32>
    %19 = vector.shape_cast %18 : vector<16xf32> to vector<16x1xf32>
    %cst_16 = arith.constant 3.200000e+01 : f32
    %20 = vector.broadcast %cst_16 : f32 to vector<16x1xf32>
    %21 = arith.divf %19, %20 : vector<16x1xf32>
    %22 = vector.broadcast %21 : vector<16x1xf32> to vector<16x32xf32>
    %23 = arith.subf %15, %22 : vector<16x32xf32>
    %24 = arith.mulf %23, %23 : vector<16x32xf32>
    %cst_17 = arith.constant dense<0.000000e+00> : vector<16xf32>
    %25 = vector.multi_reduction <add>, %24, %cst_17 [1] : vector<16x32xf32> to vector<16xf32>
    %26 = vector.shape_cast %25 : vector<16xf32> to vector<16x1xf32>
    %cst_18 = arith.constant 3.200000e+01 : f32
    %27 = vector.broadcast %cst_18 : f32 to vector<16x1xf32>
    %28 = arith.divf %26, %27 : vector<16x1xf32>
    %29 = vector.broadcast %21 : vector<16x1xf32> to vector<16x32xf32>
    %30 = arith.subf %15, %29 : vector<16x32xf32>
    %cst_19 = arith.constant 9.99999974E-6 : f32
    %31 = vector.broadcast %cst_19 : f32 to vector<16x1xf32>
    %32 = arith.addf %28, %31 : vector<16x1xf32>
    %33 = math.rsqrt %32 : vector<16x1xf32>
    %34 = vector.broadcast %33 : vector<16x1xf32> to vector<16x32xf32>
    %35 = arith.mulf %30, %34 : vector<16x32xf32>
    %36 = vector.broadcast %16 : vector<1x32xf32> to vector<16x32xf32>
    %37 = arith.mulf %35, %36 : vector<16x32xf32>
    %38 = vector.broadcast %17 : vector<1x32xf32> to vector<16x32xf32>
    %39 = arith.addf %37, %38 : vector<16x32xf32>
    %c0_20 = arith.constant 0 : index
    %c0_21 = arith.constant 0 : index
    %40 = vector.load %arg8[%c0_20, %c0_21] : memref<16x32xf32, #tpu.memory_space<vmem>>, vector<16x32xf32>
    tpu.vector_store %arg8[%c0_20, %c0_21], %39 {strides = array<i32>} : memref<16x32xf32, #tpu.memory_space<vmem>>, vector<16x32xf32>,
    return
  }
  func.func @transform_0(%arg0: i32) -> (i32, i32) {
    %c0_i32 = arith.constant 0 : i32
    %c0_i32_0 = arith.constant 0 : i32
    return %arg0, %c0_i32 : i32, i32
  }
  func.func @transform_1(%arg0: i32) -> (i32, i32) {
    %c0_i32 = arith.constant 0 : i32
    %c0_i32_0 = arith.constant 0 : i32
    %c0_i32_1 = arith.constant 0 : i32
    return %c0_i32, %c0_i32_0 : i32, i32
  }
  func.func @transform_2(%arg0: i32) -> (i32, i32) {
    %c0_i32 = arith.constant 0 : i32
    %c0_i32_0 = arith.constant 0 : i32
    %c0_i32_1 = arith.constant 0 : i32
    return %c0_i32, %c0_i32_0 : i32, i32
  }
  func.func @transform_3(%arg0: i32) -> (i32, i32) {
    %c0_i32 = arith.constant 0 : i32
    %c0_i32_0 = arith.constant 0 : i32
    %c0_i32_1 = arith.constant 0 : i32
    return %c0_i32, %c0_i32_0 : i32, i32
  }
  func.func @transform_4(%arg0: i32) -> (i32, i32) {
    %c0_i32 = arith.constant 0 : i32
    %c0_i32_0 = arith.constant 0 : i32
    %c0_i32_1 = arith.constant 0 : i32
    return %c0_i32, %c0_i32_0 : i32, i32
  }
  func.func @transform_5(%arg0: i32) -> (i32, i32) {
    %c0_i32 = arith.constant 0 : i32
    %c0_i32_0 = arith.constant 0 : i32
    %c0_i32_1 = arith.constant 0 : i32
    return %c0_i32, %c0_i32_0 : i32, i32
  }
  func.func @transform_6(%arg0: i32) -> (i32, i32) {
    %c0_i32 = arith.constant 0 : i32
    %c0_i32_0 = arith.constant 0 : i32
    %c0_i32_1 = arith.constant 0 : i32
    return %c0_i32, %c0_i32_0 : i32, i32
  }
  func.func @transform_7(%arg0: i32) -> (i32, i32) {
    %c0_i32 = arith.constant 0 : i32
    %c0_i32_0 = arith.constant 0 : i32
    return %arg0, %c0_i32 : i32, i32
  }
}

</mosaic_0001>

<bundles_post_ra>
// kernel: transformer_forward.36
= control target key start
LH: loop header
LB: loop body
LE: loop exit
PB: predicated region body
PF: predicated region fallthrough
CT: control target
= control target key end

     0   :  { %v111_v0 = vmov 0.0   ;;  %vm112_vm0 = vmmov 0   ;;  %vm41_vm1 = vcmask 261120   ;;  %s154_s1 = inlined_call_operand.vmem [shape: bf16[32,32], index: 1, kind: input, shape index: {}]   ;;  %s155_s0 = inlined_call_operand.vmem [shape: f32[16,32], index: 0, kind: input, shape index: {}]   ;;  %s156_s2 = inlined_call_operand.vmem [shape: f32[1,32], index: 2, kind: input, shape index: {}]   ;;  %s157_s3 = inlined_call_operand.vmem [shape: f32[16,32], index: 3, kind: output, shape index: {}]  }
   0x1   :  { %99 = vmatprep.subr.bf16.mxu0 %v111_v0  ;;  %v109_v1 = vld [vmem:[%s154_s1] sm:$0xff]   ;;  %103 = vmatprep.mubr.msk.bf16.mxu0 %vm112_vm0, %v111_v0  ;;  %v110_v2 = vld [vmem:[%s154_s1 + $0x8] sm:$0xff]  }
   0x2   :  { %100 = vmatpush3.bf16.msra.mxu0 %v109_v1  ;;  %v15_v3 = vld [vmem:[%s155_s0] sm:$0xff]  ;;  %v16_v4 = vld [vmem:[%s155_s0 + $0x8] sm:$0xff] }
   0x3   :  { %101 = vmatprep.subr.bf16.mxu0 %v111_v0  ;;  %v17_v5 = vpack.c.bf16 %v16_v4, %v15_v3  ;;  %v92_v6 = vld [vmem:[%s156_s2] ss:$0 sm:$0xff] }
   0x6   :  { %102 = vmatpush3.bf16.msra.mxu0 %v110_v2 }
   0x9   :  { %104 = vmatmul.mubr.msk.bf16.vlgmr.msra.gmra.mrb[0].mxu0 %vm41_vm1, %v17_v5 }
  0xdc   :  { %v79_v7 = vpop.f32.mrb[0].mxu0 }
  0xdd   :  { %v80_v8 = vadd.f32 %v92_v6, %v79_v7  ;;  %v105_v9 = vpop.f32.mrb[1].mxu0 }
  0xde   :  { %v82_v10 = vpop.f32.mrb[2].mxu0 }
  0xdf   :  { %86 = vst.msk [vmem:[%s157_s3] sm:$0xff] %vm41_vm1, %v80_v8  ;;  %v83_v11 = vadd.f32 %v92_v6, %v82_v10  ;;  %v106_v12 = vpop.f32.mrb[3].mxu0 }
  0xe1   :  { %87 = vst.msk [vmem:[%s157_s3 + $0x8] sm:$0xff] %vm41_vm1, %v83_v11 }

// kernel: transformer_forward.33
= control target key start
LH: loop header
LB: loop body
LE: loop exit
PB: predicated region body
PF: predicated region fallthrough
CT: control target
= control target key end

     0   :  { %v142_v0 = vmov 0.0   ;;  %vm143_vm0 = vmmov 0   ;;  %vm44_vm1 = vcmask 261120   ;;  %s145_s29 = smov 96   ;;  %s216_s1 = inlined_call_operand.vmem [shape: bf16[32,96], index: 1, kind: input, shape index: {}]   ;;  %s217_s0 = inlined_call_operand.vmem [shape: f32[16,32], index: 0, kind: input, shape index: {}]   ;;  %s218_s2 = inlined_call_operand.vmem [shape: f32[1,96], index: 2, kind: input, shape index: {}]   ;;  %s219_s3 = inlined_call_operand.vmem [shape: f32[16,32], index: 3, kind: output, shape index: {0}]   ;;  %s220_s5 = inlined_call_operand.vmem [shape: f32[16,32], index: 5, kind: output, shape index: {2}]   ;;  %s221_s4 = inlined_call_operand.vmem [shape: f32[16,32], index: 4, kind: output, shape index: {1}]  }
   0x1   :  { %128 = vmatprep.subr.bf16.mxu0 %v142_v0  ;;  %v140_v1 = vld [vmem:[%s216_s1] sm:$0xff]   ;;  %132 = vmatprep.mubr.msk.bf16.mxu0 %vm143_vm0, %v142_v0  ;;  %v141_v2 = vld [vmem:[%s216_s1 + $0x8] sm:$0xff]  }
   0x2   :  { %129 = vmatpush3.bf16.msra.mxu0 %v140_v1  ;;  %v18_v3 = vld [vmem:[%s217_s0] sm:$0xff]  ;;  %v19_v4 = vld [vmem:[%s217_s0 + $0x8] sm:$0xff]  ;;  %s144_s0 = smov 64  }
   0x3   :  { %130 = vmatprep.subr.bf16.mxu0 %v142_v0  ;;  %v20_v5 = vpack.c.bf16 %v19_v4, %v18_v3  ;;  %v121_v6 = vld [vmem:[%s218_s2] ss:$0 sm:$0xff] }
   0x6   :  { %131 = vmatpush3.bf16.msra.mxu0 %v141_v2 }
   0x9   :  { %133 = vmatmul.mubr.msk.bf16.vlgmr.msra.gmra.mrb[0].mxu0 %vm44_vm1, %v20_v5 }
  0xdc   :  { %v82_v7 = vpop.f32.mrb[0].mxu0 }
  0xdd   :  { %v83_v8 = vadd.f32 %v121_v6, %v82_v7  ;;  %v134_v9 = vpop.f32.mrb[1].mxu0 }
  0xde   :  { %v85_v10 = vpop.f32.mrb[2].mxu0 }
  0xdf   :  { %89 = vst.msk [vmem:[%s219_s3] sm:$0xff] %vm44_vm1, %v83_v8  ;;  %v86_v11 = vadd.f32 %v121_v6, %v85_v10  ;;  %101 = vrot.lane.b32.xlu1 %v83_v8, %s144_s0  ;;  %93 = vrot.lane.b32.xlu0 %v83_v8, %s145_s29  ;;  %v135_v12 = vpop.f32.mrb[3].mxu0 }
  0xe1   :  { %90 = vst.msk [vmem:[%s219_s3 + $0x8] sm:$0xff] %vm44_vm1, %v86_v11 }
  0xe3   :  { %103 = vrot.lane.b32.xlu1 %v86_v11, %s144_s0  ;;  %95 = vrot.lane.b32.xlu0 %v86_v11, %s145_s29 }
 0x151   :  { %v102_v13 = vpop.permute.xlu1 %101  ;;  %v94_v14 = vpop.permute.xlu0 %93 }
 0x152   :  { %107 = vst.msk [vmem:[%s220_s5] sm:$0xff] %vm44_vm1, %v102_v13  ;;  %99 = vst.msk [vmem:[%s221_s4] sm:$0xff] %vm44_vm1, %v94_v14 }
 0x155   :  { %v104_v15 = vpop.permute.xlu1 %103  ;;  %v96_v16 = vpop.permute.xlu0 %95 }
 0x156   :  { %108 = vst.msk [vmem:[%s220_s5 + $0x8] sm:$0xff] %vm44_vm1, %v104_v15  ;;  %100 = vst.msk [vmem:[%s221_s4 + $0x8] sm:$0xff] %vm44_vm1, %v96_v16 }

// kernel: transformer_forward.34
= control target key start
LH: loop header
LB: loop body
LE: loop exit
PB: predicated region body
PF: predicated region fallthrough
CT: control target
= control target key end

     0   :  { %s903_s12 = smov 0   ;;  %s1017_s0 = inlined_call_operand.vmem [shape: f32[2,8,32], index: 0, kind: input, shape index: {}]   ;;  %s1018_s1 = inlined_call_operand.vmem [shape: f32[2,8,32], index: 1, kind: input, shape index: {}]   ;;  %s1019_s2 = inlined_call_operand.vmem [shape: f32[2,8,32], index: 2, kind: input, shape index: {}]   ;;  %s1020_s3 = inlined_call_operand.vmem [shape: f32[2,8,32], index: 3, kind: output, shape index: {}]  }
   0x1 LB: > { %s752_s13 = sadd.s32 4294967295, %s873_s12   ;;  %p756_p0 = scmp.ge.s32.totalorder %s873_s12, 1  ;;  %s873_s12 = sphi %s903_s12, %s13_s12  }
   0x2   : > { %p154_p1 = scmp.lt.s32.totalorder %s873_s12, 3 }
   0x4   : > { %p155_p2 = pnand %p756_p0, %p154_p1 }
   0x5   : > { %p184_p3 = scmp.lt.s32.totalorder (!%p155_p2), %s752_s13, 1  ;;  %v875_v0 = vmov (!%p155_p2), 0.0   ;;  %vm876_vm0 = vmmov (!%p155_p2), 0   ;;  %vm213_vm1 = vcmask (!%p155_p2), 64512   ;;  %v205_v7 = vlaneseq (!%p155_p2)  ;;  %s877_s21 = smov (!%p155_p2), 120  }
   0x6   : > { %158 = sbr.rel (%p155_p2) target bundleno = 1475 (0x5c3), region = 32  ;;  %787 = vmatprep.subr.bf16.mxu0 (!%p155_p2), %v875_v0  ;;  %789 = vmatprep.mubr.msk.bf16.mxu0 (!%p155_p2), %vm876_vm0, %v875_v0  ;;  %s878_s22 = smov (!%p155_p2), 112   ;;  %vm276_vm3 = vcmask (!%p155_p2), 1043456   ;;  %vm669_vm4 = vcmask (!%p155_p2), 130048   ;;  %vm671_vm5 = vcmask (!%p155_p2), 195584   ;;  %vm673_vm6 = vcmask (!%p155_p2), 261120  }
   0x7   : > { %793 = vmatprep.subr.bf16.mxu1 (!%p155_p2), %v875_v0  ;;  %795 = vmatprep.mubr.msk.bf16.mxu1 (!%p155_p2), %vm876_vm0, %v875_v0  ;;  %v932_v8 = vshrl.u32 (!%p155_p2), %v205_v7, 7  ;;  %v934_v9 = vand.u32 (!%p155_p2), 127, %v205_v7  ;;  %s879_s23 = smov (!%p155_p2), 104   ;;  %s880_s27 = smov (!%p155_p2), 8  }
   0x8   : > { %s881_s28 = smov (!%p155_p2), 16   ;;  %s882_s29 = smov (!%p155_p2), 24  }
   0x9   : > { %vm209_vm2 = vcmp.le.s32.totalorder (!%p155_p2), %v934_v9, %v932_v8 }
   0xd   : > { %s1022_s13 = smov (!%p184_p3, %s752_s13), 1 }
   0xe   : > { %s917_s14 = sshll.u32 %s1022_s13, 3 }
   0xf   : > { %s191_s17 = scalar_lea.vmem %s1018_s1, %s917_s14  ;;  %s187_s20 = scalar_lea.vmem %s1017_s0, %s917_s14 }
  0x10   : > { %v203_v1 = vld [vmem:[%s191_s17] sm:$0xff]  ;;  %s195_s26 = scalar_lea.vmem %s1019_s2, %s917_s14  ;;  %s199_s5 = scalar_lea.vmem %s1020_s3, %s917_s14 }
  0x11   : > { %v201_v2 = vld [vmem:[%s187_s20] sm:$0xff]  ;;  %v211_v3 = vpack.c.bf16 %v203_v1, %v203_v1 }
  0x12   : > { %v202_v5 = vmul.f32 0.35355338, %v201_v2  ;;  %v204_v21 = vld [vmem:[%s195_s26] sm:$0xff] }
  0x13   : > { %v218_v4 = vsel %vm213_vm1, %v211_v3, 0  ;;  %324 = vrot.lane.b32.xlu1 %v211_v3, %s877_s21  ;;  %v952_v22 = vpack.c.bf16 %v204_v21, %v204_v21 }
  0x14   : > { %788 = vmatpush3.bf16.xpose.msra.mxu0 %v218_v4  ;;  %v210_v6 = vpack.c.bf16 %v202_v5, %v202_v5 }
  0x15   : > { %805 = vmatprep.subr.bf16.mxu0 %v875_v0  ;;  %v278_v23 = vsel %vm276_vm3, %v952_v22, 0 }
  0x16   : > { %794 = vmatpush3.bf16.msra.mxu1 %v278_v23 }
  0x17   : > { %321 = vrot.lane.b32.xlu1 %v210_v6, %s877_s21  ;;  %799 = vmatprep.subr.bf16.mxu1 %v875_v0 }
  0x1b   : > { %790 = vmatmul.mubr.msk.bf16.vlgmr.msra.gmra.mrb[0].mxu0 %vm213_vm1, %v210_v6  ;;  %434 = vrot.lane.b32.xlu1 %v210_v6, %s878_s22 }
  0x1c   : > { %807 = vmatprep.mubr.msk.bf16.mxu0 %vm876_vm0, %v875_v0 }
  0x1f   : > { %547 = vrot.lane.b32.xlu1 %v211_v3, %s879_s23 }
  0x23   : > { %545 = vrot.lane.b32.xlu1 %v210_v6, %s879_s23 }
  0x85   : > { %v325_v26 = vpop.permute.xlu1 %324 }
  0x86   : > { %v330_v28 = vsel %vm213_vm1, %v325_v26, 0 }
  0x89   : > { %v322_v30 = vpop.permute.xlu1 %321 }
  0x8d   : > { %v435_v32 = vpop.permute.xlu1 %434 }
  0x91   : > { %v548_v34 = vpop.permute.xlu1 %547 }
  0x92   : > { %v553_v35 = vsel %vm213_vm1, %v548_v34, 0 }
  0x95   : > { %v546_v36 = vpop.permute.xlu1 %545 }
  0xee   : > { %v254_v10 = vpop.f32.mrb[0].mxu0 }
  0xef   : > { %v260_v11 = vsel %vm209_vm2, %v254_v10, -1e+30  ;;  %v791_v12 = vpop.f32.mrb[1].mxu0 }
  0xf0   : > { %v257_v13 = vpop.f32.mrb[2].mxu0  ;;  %v261_v14 = vsel %vm213_vm1, %v260_v11, -inf }
  0xf1   : > { %262 = vmax.xlane.f32.xlu0 %v261_v14  ;;  %v792_v15 = vpop.f32.mrb[3].mxu0 }
 0x17e   : > { %v263_v16 = vpop.xlane.xlu0 %262 }
 0x17f   : > { %v264_v17 = vsub.f32 %v260_v11, %v263_v16 }
 0x181   : > { %v265_v18 = vmul.f32 1.442695, %v264_v17 }
 0x183   : > { %851 = vpow2.f32 %v265_v18 }
 0x18d   : > { %v852_v19 = vpop.eup %851 }
 0x18e   : > { %v267_v20 = vsel %vm213_vm1, %v852_v19, 0.0 }
 0x18f   : > { %268 = vadd.xlane.f32.xlu0 %v267_v20 }
 0x1a5   : > { %436 = vrot.lane.b32.xlu0 %v211_v3, %s878_s22 }
 0x21c   : > { %v269_v24 = vpop.xlane.xlu0 %268 }
 0x21d   : > { %853 = vrcp.f32 %v269_v24 }
 0x220   : > { %v437_v31 = vpop.permute.xlu0 %436 }
 0x221   : > { %v442_v33 = vsel %vm213_vm1, %v437_v31, 0 }
 0x227   : > { %v854_v25 = vpop.eup %853 }
 0x228   : > { %v271_v27 = vmul.f32 %v854_v25, %v852_v19 }
 0x22a   : > { %v272_v29 = vpack.c.bf16 %v271_v27, %v271_v27 }
 0x22c   : > { %796 = vmatmul.mubr.msk.bf16.vlgmr.msra.gmra.mrb[0].mxu1 %vm213_vm1, %v272_v29 }
 0x22d   : > { %800 = vmatpush3.bf16.xpose.msra.mxu1 %v330_v28  ;;  %801 = vmatprep.mubr.msk.bf16.mxu1 %vm876_vm0, %v875_v0 }
 0x22e   : > { %811 = vmatprep.subr.bf16.mxu1 %v875_v0 }
 0x234   : > { %802 = vmatmul.mubr.msk.bf16.vlgmr.msra.gmra.mrb[4].mxu1 %vm213_vm1, %v322_v30 }
 0x235   : > { %812 = vmatpush3.bf16.xpose.msra.mxu1 %v442_v33  ;;  %813 = vmatprep.mubr.msk.bf16.mxu1 %vm876_vm0, %v875_v0 }
 0x236   : > { %823 = vmatprep.subr.bf16.mxu1 %v875_v0 }
 0x23c   : > { %814 = vmatmul.mubr.msk.bf16.vlgmr.msra.gmra.mrb[8].mxu1 %vm213_vm1, %v435_v32 }
 0x23d   : > { %824 = vmatpush3.bf16.xpose.msra.mxu1 %v553_v35  ;;  %825 = vmatprep.mubr.msk.bf16.mxu1 %vm876_vm0, %v875_v0 }
 0x244   : > { %826 = vmatmul.mubr.msk.bf16.vlgmr.msra.gmra.mrb[12].mxu1 %vm213_vm1, %v546_v36 }
 0x2ff   : > { %v973_v37 = vpop.f32.mrb[0].mxu1 }
 0x300   : > { %v797_v38 = vpop.f32.mrb[1].mxu1 }
 0x301   : > { %v317_v39 = vpop.f32.mrb[2].mxu1 }
 0x302   : > { %v798_v40 = vpop.f32.mrb[3].mxu1 }
 0x307   : > { %v366_v41 = vpop.f32.mrb[4].mxu1 }
 0x308   : > { %v372_v42 = vsel %vm209_vm2, %v366_v41, -1e+30  ;;  %v803_v43 = vpop.f32.mrb[5].mxu1 }
 0x309   : > { %v369_v44 = vpop.f32.mrb[6].mxu1  ;;  %v373_v45 = vsel %vm213_vm1, %v372_v42, -inf }
 0x30a   : > { %374 = vmax.xlane.f32.xlu1 %v373_v45  ;;  %v804_v46 = vpop.f32.mrb[7].mxu1 }
 0x30f   : > { %v478_v47 = vpop.f32.mrb[8].mxu1 }
 0x310   : > { %v484_v48 = vsel %vm209_vm2, %v478_v47, -1e+30  ;;  %v815_v49 = vpop.f32.mrb[9].mxu1 }
 0x311   : > { %v485_v50 = vsel %vm213_vm1, %v484_v48, -inf  ;;  %v481_v51 = vpop.f32.mrb[10].mxu1 }
 0x312   : > { %486 = vmax.xlane.f32.xlu0 %v485_v50  ;;  %v816_v52 = vpop.f32.mrb[11].mxu1 }
 0x317   : > { %v589_v53 = vpop.f32.mrb[12].mxu1 }
 0x318   : > { %v595_v54 = vsel %vm209_vm2, %v589_v53, -1e+30  ;;  %v827_v55 = vpop.f32.mrb[13].mxu1 }
 0x319   : > { %v596_v56 = vsel %vm213_vm1, %v595_v54, -inf  ;;  %v592_v57 = vpop.f32.mrb[14].mxu1 }
 0x31a   : > { %597 = vmax.xlane.f32.xlu1 %v596_v56  ;;  %v828_v58 = vpop.f32.mrb[15].mxu1 }
 0x397   : > { %v375_v59 = vpop.xlane.xlu1 %374 }
 0x398   : > { %v376_v60 = vsub.f32 %v372_v42, %v375_v59 }
 0x39a   : > { %v377_v61 = vmul.f32 1.442695, %v376_v60 }
 0x39c   : > { %855 = vpow2.f32 %v377_v61 }
 0x39f   : > { %v487_v62 = vpop.xlane.xlu0 %486 }
 0x3a0   : > { %v488_v63 = vsub.f32 %v484_v48, %v487_v62 }
 0x3a2   : > { %v489_v1 = vmul.f32 1.442695, %v488_v63 }
 0x3a4   : > { %857 = vpow2.f32 %v489_v1 }
 0x3a6   : > { %v856_v2 = vpop.eup %855 }
 0x3a7   : > { %v379_v3 = vsel %vm213_vm1, %v856_v2, 0.0  ;;  %v598_v6 = vpop.xlane.xlu1 %597 }
 0x3a8   : > { %380 = vadd.xlane.f32.xlu1 %v379_v3  ;;  %v599_v7 = vsub.f32 %v595_v54, %v598_v6 }
 0x3aa   : > { %v600_v8 = vmul.f32 1.442695, %v599_v7 }
 0x3ac   : > { %859 = vpow2.f32 %v600_v8 }
 0x3ae   : > { %v858_v4 = vpop.eup %857 }
 0x3af   : > { %v491_v5 = vsel %vm213_vm1, %v858_v4, 0.0 }
 0x3b0   : > { %492 = vadd.xlane.f32.xlu0 %v491_v5 }
 0x3b6   : > { %v860_v9 = vpop.eup %859 }
 0x3b7   : > { %v602_v10 = vsel %vm213_vm1, %v860_v9, 0.0 }
 0x3b9   : > { %497 = vrot.lane.b32.xlu1 %v952_v22, %s878_s22 }
 0x3c6   : > { %386 = vrot.lane.b32.xlu0 %v952_v22, %s877_s21 }
 0x3dd   : > { %603 = vadd.xlane.f32.xlu1 %v602_v10 }
 0x3ee   : > { %608 = vrot.lane.b32.xlu1 %v952_v22, %s879_s23 }
 0x435   : > { %v381_v11 = vpop.xlane.xlu1 %380 }
 0x436   : > { %861 = vrcp.f32 %v381_v11 }
 0x439   : > { %v498_v17 = vpop.permute.xlu1 %497 }
 0x43a   : > { %v503_v19 = vsel %vm276_vm3, %v498_v17, 0 }
 0x43d   : > { %v493_v12 = vpop.xlane.xlu0 %492 }
 0x43e   : > { %863 = vrcp.f32 %v493_v12 }
 0x440   : > { %v862_v13 = vpop.eup %861 }
 0x441   : > { %v383_v14 = vmul.f32 %v862_v13, %v856_v2  ;;  %v387_v15 = vpop.permute.xlu0 %386 }
 0x442   : > { %v392_v16 = vsel %vm276_vm3, %v387_v15, 0 }
 0x443   : > { %806 = vmatpush3.bf16.msra.mxu0 %v392_v16  ;;  %v384_v18 = vpack.c.bf16 %v383_v14, %v383_v14 }
 0x444   : > { %817 = vmatprep.subr.bf16.mxu0 %v875_v0 }
 0x446   : > { %808 = vmatmul.mubr.msk.bf16.vlgmr.msra.gmra.mrb[4].mxu0 %vm213_vm1, %v384_v18 }
 0x447   : > { %818 = vmatpush3.bf16.msra.mxu0 %v503_v19  ;;  %819 = vmatprep.mubr.msk.bf16.mxu0 %vm876_vm0, %v875_v0 }
 0x448   : > { %v864_v20 = vpop.eup %863  ;;  %829 = vmatprep.subr.bf16.mxu0 %v875_v0 }
 0x449   : > { %v495_v21 = vmul.f32 %v864_v20, %v858_v4 }
 0x44b   : > { %v496_v22 = vpack.c.bf16 %v495_v21, %v495_v21 }
 0x44e   : > { %820 = vmatmul.mubr.msk.bf16.vlgmr.msra.gmra.mrb[8].mxu0 %vm213_vm1, %v496_v22 }
 0x44f   : > { %831 = vmatprep.mubr.msk.bf16.mxu0 %vm876_vm0, %v875_v0 }
 0x46a   : > { %v604_v23 = vpop.xlane.xlu1 %603 }
 0x46b   : > { %865 = vrcp.f32 %v604_v23 }
 0x46e   : > { %v609_v24 = vpop.permute.xlu1 %608 }
 0x46f   : > { %v614_v25 = vsel %vm276_vm3, %v609_v24, 0 }
 0x470   : > { %830 = vmatpush3.bf16.msra.mxu0 %v614_v25 }
 0x475   : > { %v866_v26 = vpop.eup %865 }
 0x476   : > { %v606_v27 = vmul.f32 %v866_v26, %v860_v9 }
 0x478   : > { %v607_v28 = vpack.c.bf16 %v606_v27, %v606_v27 }
 0x47a   : > { %832 = vmatmul.mubr.msk.bf16.vlgmr.msra.gmra.mrb[12].mxu0 %vm213_vm1, %v607_v28 }
 0x519   : > { %v428_v29 = vpop.f32.mrb[4].mxu0 }
 0x51a   : > { %657 = vrot.lane.b32.xlu0 %v428_v29, %s880_s27  ;;  %v809_v30 = vpop.f32.mrb[5].mxu0 }
 0x51b   : > { %v431_v31 = vpop.f32.mrb[6].mxu0 }
 0x51c   : > { %v810_v32 = vpop.f32.mrb[7].mxu0 }
 0x521   : > { %v539_v33 = vpop.f32.mrb[8].mxu0 }
 0x522   : > { %661 = vrot.lane.b32.xlu1 %v539_v33, %s881_s28  ;;  %v821_v0 = vpop.f32.mrb[9].mxu0 }
 0x523   : > { %v542_v34 = vpop.f32.mrb[10].mxu0 }
 0x524   : > { %v822_v35 = vpop.f32.mrb[11].mxu0 }
 0x54d   : > { %v650_v36 = vpop.f32.mrb[12].mxu0 }
 0x54e   : > { %665 = vrot.lane.b32.xlu0 %v650_v36, %s882_s29  ;;  %v833_v38 = vpop.f32.mrb[13].mxu0 }
 0x54f   : > { %v653_v39 = vpop.f32.mrb[14].mxu0 }
 0x550   : > { %v834_v40 = vpop.f32.mrb[15].mxu0 }
 0x58c   : > { %v658_v41 = vpop.permute.xlu0 %657 }
 0x58d   : > { %v668_v43 = vsel %vm213_vm1, %v973_v37, %v658_v41 }
 0x594   : > { %v662_v42 = vpop.permute.xlu1 %661 }
 0x595   : > { %v670_v44 = vsel %vm669_vm4, %v668_v43, %v662_v42 }
 0x5c0   : > { %v666_v45 = vpop.permute.xlu0 %665 }
 0x5c1   : > { %v672_v46 = vsel %vm671_vm5, %v670_v44, %v666_v45 }
 0x5c2   : > { %674 = vst.msk [vmem:[%s199_s5] sm:$0xff] %vm673_vm6, %v672_v46 }
 0x5c3 PF: > { %s13_s12 = sadd.s32 1, %s873_s12  }
 0x5c4   : > { %p10_p4 = scmp.ge.s32.totalorder %s13_s12, 4  }
 0x5c6   :  { %12 = sbr.rel (!%p10_p4) target bundleno = 1 (0x1), region = 68 }

// kernel: transformer_forward.35
= control target key start
LH: loop header
LB: loop body
LE: loop exit
PB: predicated region body
PF: predicated region fallthrough
CT: control target
= control target key end

     0   :  { %v175_v0 = vmov 0.0   ;;  %vm176_vm0 = vmmov 0   ;;  %vm50_vm1 = vcmask 261120   ;;  %s252_s2 = inlined_call_operand.vmem [shape: bf16[32,32], index: 2, kind: input, shape index: {}]   ;;  %s253_s0 = inlined_call_operand.vmem [shape: f32[16,32], index: 0, kind: input, shape index: {}]   ;;  %s254_s3 = inlined_call_operand.vmem [shape: f32[1,32], index: 3, kind: input, shape index: {}]   ;;  %s255_s1 = inlined_call_operand.vmem [shape: f32[16,32], index: 1, kind: input, shape index: {}]   ;;  %s256_s4 = inlined_call_operand.vmem [shape: f32[1,32], index: 4, kind: input, shape index: {}]   ;;  %s257_s5 = inlined_call_operand.vmem [shape: f32[1,32], index: 5, kind: input, shape index: {}]   ;;  %s258_s6 = inlined_call_operand.vmem [shape: f32[16,32], index: 6, kind: output, shape index: {}]  }
   0x1   :  { %159 = vmatprep.subr.bf16.mxu0 %v175_v0  ;;  %v169_v1 = vld [vmem:[%s252_s2] sm:$0xff]   ;;  %163 = vmatprep.mubr.msk.bf16.mxu0 %vm176_vm0, %v175_v0  ;;  %v170_v2 = vld [vmem:[%s252_s2 + $0x8] sm:$0xff]  }
   0x2   :  { %160 = vmatpush3.bf16.msra.mxu0 %v169_v1  ;;  %v24_v3 = vld [vmem:[%s253_s0] sm:$0xff]  ;;  %v25_v4 = vld [vmem:[%s253_s0 + $0x8] sm:$0xff] }
   0x3   :  { %161 = vmatprep.subr.bf16.mxu0 %v175_v0  ;;  %v26_v5 = vpack.c.bf16 %v25_v4, %v24_v3  ;;  %v150_v6 = vld [vmem:[%s254_s3] ss:$0 sm:$0xff]  ;;  %v96_v12 = vld [vmem:[%s255_s1 + $0x8] sm:$0xff] }
   0x4   :  { %v95_v8 = vld [vmem:[%s255_s1] sm:$0xff] }
   0x5   :  { %v154_v36 = vld [vmem:[%s256_s4] ss:$0 sm:$0xff] }
   0x6   :  { %162 = vmatpush3.bf16.msra.mxu0 %v170_v2  ;;  %v155_v38 = vld [vmem:[%s257_s5] ss:$0 sm:$0xff] }
   0x9   :  { %164 = vmatmul.mubr.msk.bf16.vlgmr.msra.gmra.mrb[0].mxu0 %vm50_vm1, %v26_v5 }
  0xdc   :  { %v88_v7 = vpop.f32.mrb[0].mxu0 }
  0xdd   :  { %v89_v9 = vadd.f32 %v150_v6, %v88_v7  ;;  %v165_v10 = vpop.f32.mrb[1].mxu0 }
  0xde   :  { %v91_v11 = vpop.f32.mrb[2].mxu0 }
  0xdf   :  { %v92_v13 = vadd.f32 %v150_v6, %v91_v11  ;;  %v166_v14 = vpop.f32.mrb[3].mxu0  ;;  %v97_v15 = vadd.f32 %v95_v8, %v89_v9 }
  0xe1   :  { %v101_v16 = vsel %vm50_vm1, %v97_v15, 0.0  ;;  %v98_v17 = vadd.f32 %v96_v12, %v92_v13 }
  0xe2   :  { %102 = vadd.xlane.f32.xlu0 %v101_v16 }
  0xe3   :  { %v104_v18 = vsel %vm50_vm1, %v98_v17, 0.0 }
  0xe6   :  { %105 = vadd.xlane.f32.xlu0 %v104_v18 }
 0x16f   :  { %v103_v19 = vpop.xlane.xlu0 %102 }
 0x170   :  { %v108_v20 = vmul.f32 0.03125, %v103_v19 }
 0x172   :  { %v110_v21 = vsub.f32 %v97_v15, %v108_v20 }
 0x173   :  { %v106_v22 = vpop.xlane.xlu0 %105 }
 0x174   :  { %v109_v23 = vmul.f32 0.03125, %v106_v22  ;;  %v112_v24 = vmul.f32 %v110_v21, %v110_v21 }
 0x176   :  { %v111_v25 = vsub.f32 %v98_v17, %v109_v23  ;;  %v114_v26 = vsel %vm50_vm1, %v112_v24, 0.0 }
 0x177   :  { %115 = vadd.xlane.f32.xlu1 %v114_v26 }
 0x178   :  { %v113_v27 = vmul.f32 %v111_v25, %v111_v25 }
 0x17a   :  { %v117_v28 = vsel %vm50_vm1, %v113_v27, 0.0 }
 0x17b   :  { %118 = vadd.xlane.f32.xlu1 %v117_v28 }
 0x204   :  { %v116_v29 = vpop.xlane.xlu1 %115 }
 0x205   :  { %v120_v30 = vmul.f32 0.03125, %v116_v29 }
 0x207   :  { %v122_v31 = vadd.f32 1e-05, %v120_v30 }
 0x208   :  { %v119_v32 = vpop.xlane.xlu1 %118 }
 0x209   :  { %171 = vrsqrt.f32 %v122_v31  ;;  %v121_v33 = vmul.f32 0.03125, %v119_v32 }
 0x20b   :  { %v123_v34 = vadd.f32 1e-05, %v121_v33 }
 0x20d   :  { %173 = vrsqrt.f32 %v123_v34 }
 0x213   :  { %v172_v35 = vpop.eup %171 }
 0x214   :  { %v126_v37 = vmul.f32 %v172_v35, %v110_v21 }
 0x216   :  { %v134_v39 = vmul.f32 %v154_v36, %v126_v37 }
 0x217   :  { %v174_v40 = vpop.eup %173 }
 0x218   :  { %v142_v41 = vadd.f32 %v155_v38, %v134_v39  ;;  %v127_v42 = vmul.f32 %v174_v40, %v111_v25 }
 0x21a   :  { %144 = vst.msk [vmem:[%s258_s6] sm:$0xff] %vm50_vm1, %v142_v41  ;;  %v135_v43 = vmul.f32 %v154_v36, %v127_v42 }
 0x21c   :  { %v143_v44 = vadd.f32 %v155_v38, %v135_v43 }
 0x21e   :  { %145 = vst.msk [vmem:[%s258_s6 + $0x8] sm:$0xff] %vm50_vm1, %v143_v44 }

// kernel: transformer_forward.37
= control target key start
LH: loop header
LB: loop body
LE: loop exit
PB: predicated region body
PF: predicated region fallthrough
CT: control target
= control target key end

     0   :  { %v128_v0 = vmov 0.0   ;;  %vm129_vm0 = vmmov 0   ;;  %vm43_vm1 = vcmask 261120   ;;  %s188_s1 = inlined_call_operand.vmem [shape: bf16[32,64], index: 1, kind: input, shape index: {}]   ;;  %s189_s0 = inlined_call_operand.vmem [shape: f32[16,32], index: 0, kind: input, shape index: {}]   ;;  %s190_s2 = inlined_call_operand.vmem [shape: f32[1,64], index: 2, kind: input, shape index: {}]   ;;  %s191_s3 = inlined_call_operand.vmem [shape: f32[16,32], index: 3, kind: output, shape index: {0}]   ;;  %s192_s4 = inlined_call_operand.vmem [shape: f32[16,32], index: 4, kind: output, shape index: {1}]  }
   0x1   :  { %115 = vmatprep.subr.bf16.mxu0 %v128_v0  ;;  %v126_v1 = vld [vmem:[%s188_s1] sm:$0xff]   ;;  %119 = vmatprep.mubr.msk.bf16.mxu0 %vm129_vm0, %v128_v0  ;;  %v127_v2 = vld [vmem:[%s188_s1 + $0x8] sm:$0xff]  }
   0x2   :  { %116 = vmatpush3.bf16.msra.mxu0 %v126_v1  ;;  %v17_v3 = vld [vmem:[%s189_s0] sm:$0xff]  ;;  %v18_v4 = vld [vmem:[%s189_s0 + $0x8] sm:$0xff]  ;;  %s130_s0 = smov 96  }
   0x3   :  { %117 = vmatprep.subr.bf16.mxu0 %v128_v0  ;;  %v19_v5 = vpack.c.bf16 %v18_v4, %v17_v3  ;;  %v108_v6 = vld [vmem:[%s190_s2] ss:$0 sm:$0xff] }
   0x6   :  { %118 = vmatpush3.bf16.msra.mxu0 %v127_v2 }
   0x9   :  { %120 = vmatmul.mubr.msk.bf16.vlgmr.msra.gmra.mrb[0].mxu0 %vm43_vm1, %v19_v5 }
  0xdc   :  { %v81_v7 = vpop.f32.mrb[0].mxu0 }
  0xdd   :  { %v82_v8 = vadd.f32 %v108_v6, %v81_v7  ;;  %v121_v9 = vpop.f32.mrb[1].mxu0 }
  0xde   :  { %v84_v10 = vpop.f32.mrb[2].mxu0 }
  0xdf   :  { %88 = vst.msk [vmem:[%s191_s3] sm:$0xff] %vm43_vm1, %v82_v8  ;;  %v85_v11 = vadd.f32 %v108_v6, %v84_v10  ;;  %92 = vrot.lane.b32.xlu0 %v82_v8, %s130_s0  ;;  %v122_v12 = vpop.f32.mrb[3].mxu0 }
  0xe1   :  { %89 = vst.msk [vmem:[%s191_s3 + $0x8] sm:$0xff] %vm43_vm1, %v85_v11 }
  0xe3   :  { %94 = vrot.lane.b32.xlu0 %v85_v11, %s130_s0 }
 0x151   :  { %v93_v13 = vpop.permute.xlu0 %92 }
 0x152   :  { %98 = vst.msk [vmem:[%s192_s4] sm:$0xff] %vm43_vm1, %v93_v13 }
 0x155   :  { %v95_v14 = vpop.permute.xlu0 %94 }
 0x156   :  { %99 = vst.msk [vmem:[%s192_s4 + $0x8] sm:$0xff] %vm43_vm1, %v95_v14 }

// kernel: transformer_forward.26
= control target key start
LH: loop header
LB: loop body
LE: loop exit
PB: predicated region body
PF: predicated region fallthrough
CT: control target
= control target key end

     0   :  { %s894_s12 = smov 0   ;;  %s990_s0 = inlined_call_operand.vmem [shape: f32[2,8,32], index: 0, kind: input, shape index: {}]   ;;  %s991_s1 = inlined_call_operand.vmem [shape: f32[2,8,32], index: 1, kind: input, shape index: {}]   ;;  %s992_s2 = inlined_call_operand.vmem [shape: f32[2,8,32], index: 2, kind: input, shape index: {}]   ;;  %s993_s3 = inlined_call_operand.vmem [shape: f32[2,8,32], index: 3, kind: output, shape index: {}]  }
   0x1 LB: > { %s743_s13 = sadd.s32 4294967295, %s864_s12   ;;  %p747_p0 = scmp.ge.s32.totalorder %s864_s12, 1  ;;  %s864_s12 = sphi %s894_s12, %s13_s12  }
   0x2   : > { %p154_p1 = scmp.lt.s32.totalorder %s864_s12, 3 }
   0x4   : > { %p155_p2 = pnand %p747_p0, %p154_p1 }
   0x5   : > { %p184_p3 = scmp.lt.s32.totalorder (!%p155_p2), %s743_s13, 1  ;;  %v866_v0 = vmov (!%p155_p2), 0.0   ;;  %vm867_vm0 = vmmov (!%p155_p2), 0   ;;  %vm208_vm1 = vcmask (!%p155_p2), 64512   ;;  %s868_s21 = smov (!%p155_p2), 120   ;;  %vm270_vm2 = vcmask (!%p155_p2), 1043456  }
   0x6   : > { %158 = sbr.rel (%p155_p2) target bundleno = 1473 (0x5c1), region = 32  ;;  %778 = vmatprep.subr.bf16.mxu0 (!%p155_p2), %v866_v0  ;;  %780 = vmatprep.mubr.msk.bf16.mxu0 (!%p155_p2), %vm867_vm0, %v866_v0  ;;  %s869_s22 = smov (!%p155_p2), 112   ;;  %vm660_vm3 = vcmask (!%p155_p2), 130048   ;;  %vm662_vm4 = vcmask (!%p155_p2), 195584   ;;  %vm664_vm5 = vcmask (!%p155_p2), 261120  }
   0x7   : > { %784 = vmatprep.subr.bf16.mxu1 (!%p155_p2), %v866_v0  ;;  %786 = vmatprep.mubr.msk.bf16.mxu1 (!%p155_p2), %vm867_vm0, %v866_v0  ;;  %s870_s23 = smov (!%p155_p2), 104   ;;  %s871_s27 = smov (!%p155_p2), 8  }
   0x8   : > { %s872_s28 = smov (!%p155_p2), 16   ;;  %s873_s29 = smov (!%p155_p2), 24  }
   0xd   : > { %s995_s13 = smov (!%p184_p3, %s743_s13), 1 }
   0xe   : > { %s908_s14 = sshll.u32 %s995_s13, 3 }
   0xf   : > { %s191_s17 = scalar_lea.vmem %s991_s1, %s908_s14  ;;  %s187_s20 = scalar_lea.vmem %s990_s0, %s908_s14 }
  0x10   : > { %v203_v1 = vld [vmem:[%s191_s17] sm:$0xff]  ;;  %s195_s26 = scalar_lea.vmem %s992_s2, %s908_s14  ;;  %s199_s5 = scalar_lea.vmem %s993_s3, %s908_s14 }
  0x11   : > { %v201_v2 = vld [vmem:[%s187_s20] sm:$0xff]  ;;  %v206_v3 = vpack.c.bf16 %v203_v1, %v203_v1 }
  0x12   : > { %v202_v5 = vmul.f32 0.35355338, %v201_v2  ;;  %v204_v17 = vld [vmem:[%s195_s26] sm:$0xff] }
  0x13   : > { %v213_v4 = vsel %vm208_vm1, %v206_v3, 0  ;;  %318 = vrot.lane.b32.xlu1 %v206_v3, %s868_s21  ;;  %v934_v18 = vpack.c.bf16 %v204_v17, %v204_v17 }
  0x14   : > { %779 = vmatpush3.bf16.xpose.msra.mxu0 %v213_v4  ;;  %v205_v6 = vpack.c.bf16 %v202_v5, %v202_v5 }
  0x15   : > { %796 = vmatprep.subr.bf16.mxu0 %v866_v0  ;;  %v272_v19 = vsel %vm270_vm2, %v934_v18, 0 }
  0x16   : > { %785 = vmatpush3.bf16.msra.mxu1 %v272_v19 }
  0x17   : > { %315 = vrot.lane.b32.xlu1 %v205_v6, %s868_s21  ;;  %790 = vmatprep.subr.bf16.mxu1 %v866_v0 }
  0x1b   : > { %781 = vmatmul.mubr.msk.bf16.vlgmr.msra.gmra.mrb[0].mxu0 %vm208_vm1, %v205_v6  ;;  %427 = vrot.lane.b32.xlu1 %v205_v6, %s869_s22 }
  0x1c   : > { %798 = vmatprep.mubr.msk.bf16.mxu0 %vm867_vm0, %v866_v0 }
  0x1f   : > { %539 = vrot.lane.b32.xlu1 %v206_v3, %s870_s23 }
  0x23   : > { %537 = vrot.lane.b32.xlu1 %v205_v6, %s870_s23 }
  0x85   : > { %v319_v22 = vpop.permute.xlu1 %318 }
  0x86   : > { %v324_v24 = vsel %vm208_vm1, %v319_v22, 0 }
  0x89   : > { %v316_v26 = vpop.permute.xlu1 %315 }
  0x8d   : > { %v428_v28 = vpop.permute.xlu1 %427 }
  0x91   : > { %v540_v30 = vpop.permute.xlu1 %539 }
  0x92   : > { %v545_v31 = vsel %vm208_vm1, %v540_v30, 0 }
  0x95   : > { %v538_v32 = vpop.permute.xlu1 %537 }
  0xee   : > { %v249_v7 = vpop.f32.mrb[0].mxu0 }
  0xef   : > { %v782_v8 = vpop.f32.mrb[1].mxu0  ;;  %v255_v9 = vsel %vm208_vm1, %v249_v7, -inf }
  0xf0   : > { %256 = vmax.xlane.f32.xlu0 %v255_v9  ;;  %v252_v10 = vpop.f32.mrb[2].mxu0 }
  0xf1   : > { %v783_v11 = vpop.f32.mrb[3].mxu0 }
 0x17d   : > { %v257_v12 = vpop.xlane.xlu0 %256 }
 0x17e   : > { %v258_v13 = vsub.f32 %v249_v7, %v257_v12 }
 0x180   : > { %v259_v14 = vmul.f32 1.442695, %v258_v13 }
 0x182   : > { %842 = vpow2.f32 %v259_v14 }
 0x18c   : > { %v843_v15 = vpop.eup %842 }
 0x18d   : > { %v261_v16 = vsel %vm208_vm1, %v843_v15, 0.0 }
 0x18e   : > { %262 = vadd.xlane.f32.xlu0 %v261_v16 }
 0x1a4   : > { %429 = vrot.lane.b32.xlu0 %v206_v3, %s869_s22 }
 0x21b   : > { %v263_v20 = vpop.xlane.xlu0 %262 }
 0x21c   : > { %844 = vrcp.f32 %v263_v20 }
 0x21f   : > { %v430_v27 = vpop.permute.xlu0 %429 }
 0x220   : > { %v435_v29 = vsel %vm208_vm1, %v430_v27, 0 }
 0x226   : > { %v845_v21 = vpop.eup %844 }
 0x227   : > { %v265_v23 = vmul.f32 %v845_v21, %v843_v15 }
 0x229   : > { %v266_v25 = vpack.c.bf16 %v265_v23, %v265_v23 }
 0x22b   : > { %787 = vmatmul.mubr.msk.bf16.vlgmr.msra.gmra.mrb[0].mxu1 %vm208_vm1, %v266_v25 }
 0x22c   : > { %791 = vmatpush3.bf16.xpose.msra.mxu1 %v324_v24  ;;  %792 = vmatprep.mubr.msk.bf16.mxu1 %vm867_vm0, %v866_v0 }
 0x22d   : > { %802 = vmatprep.subr.bf16.mxu1 %v866_v0 }
 0x233   : > { %793 = vmatmul.mubr.msk.bf16.vlgmr.msra.gmra.mrb[4].mxu1 %vm208_vm1, %v316_v26 }
 0x234   : > { %803 = vmatpush3.bf16.xpose.msra.mxu1 %v435_v29  ;;  %804 = vmatprep.mubr.msk.bf16.mxu1 %vm867_vm0, %v866_v0 }
 0x235   : > { %814 = vmatprep.subr.bf16.mxu1 %v866_v0 }
 0x23b   : > { %805 = vmatmul.mubr.msk.bf16.vlgmr.msra.gmra.mrb[8].mxu1 %vm208_vm1, %v428_v28 }
 0x23c   : > { %815 = vmatpush3.bf16.xpose.msra.mxu1 %v545_v31  ;;  %816 = vmatprep.mubr.msk.bf16.mxu1 %vm867_vm0, %v866_v0 }
 0x243   : > { %817 = vmatmul.mubr.msk.bf16.vlgmr.msra.gmra.mrb[12].mxu1 %vm208_vm1, %v538_v32 }
 0x2fe   : > { %v955_v33 = vpop.f32.mrb[0].mxu1 }
 0x2ff   : > { %v788_v34 = vpop.f32.mrb[1].mxu1 }
 0x300   : > { %v311_v35 = vpop.f32.mrb[2].mxu1 }
 0x301   : > { %v789_v36 = vpop.f32.mrb[3].mxu1 }
 0x306   : > { %v360_v37 = vpop.f32.mrb[4].mxu1 }
 0x307   : > { %v794_v38 = vpop.f32.mrb[5].mxu1  ;;  %v366_v39 = vsel %vm208_vm1, %v360_v37, -inf }
 0x308   : > { %367 = vmax.xlane.f32.xlu1 %v366_v39  ;;  %v363_v40 = vpop.f32.mrb[6].mxu1 }
 0x309   : > { %v795_v41 = vpop.f32.mrb[7].mxu1 }
 0x30e   : > { %v471_v42 = vpop.f32.mrb[8].mxu1 }
 0x30f   : > { %v477_v43 = vsel %vm208_vm1, %v471_v42, -inf  ;;  %v806_v44 = vpop.f32.mrb[9].mxu1 }
 0x310   : > { %478 = vmax.xlane.f32.xlu0 %v477_v43  ;;  %v474_v45 = vpop.f32.mrb[10].mxu1 }
 0x311   : > { %v807_v46 = vpop.f32.mrb[11].mxu1 }
 0x316   : > { %v581_v47 = vpop.f32.mrb[12].mxu1 }
 0x317   : > { %v587_v48 = vsel %vm208_vm1, %v581_v47, -inf  ;;  %v818_v49 = vpop.f32.mrb[13].mxu1 }
 0x318   : > { %588 = vmax.xlane.f32.xlu1 %v587_v48  ;;  %v584_v50 = vpop.f32.mrb[14].mxu1 }
 0x319   : > { %v819_v51 = vpop.f32.mrb[15].mxu1 }
 0x395   : > { %v368_v52 = vpop.xlane.xlu1 %367 }
 0x396   : > { %v369_v53 = vsub.f32 %v360_v37, %v368_v52 }
 0x398   : > { %v370_v54 = vmul.f32 1.442695, %v369_v53 }
 0x39a   : > { %846 = vpow2.f32 %v370_v54 }
 0x39d   : > { %v479_v55 = vpop.xlane.xlu0 %478 }
 0x39e   : > { %v480_v56 = vsub.f32 %v471_v42, %v479_v55 }
 0x3a0   : > { %v481_v57 = vmul.f32 1.442695, %v480_v56 }
 0x3a2   : > { %848 = vpow2.f32 %v481_v57 }
 0x3a4   : > { %v847_v58 = vpop.eup %846 }
 0x3a5   : > { %v372_v59 = vsel %vm208_vm1, %v847_v58, 0.0  ;;  %v589_v62 = vpop.xlane.xlu1 %588 }
 0x3a6   : > { %373 = vadd.xlane.f32.xlu1 %v372_v59  ;;  %v590_v63 = vsub.f32 %v581_v47, %v589_v62 }
 0x3a8   : > { %v591_v1 = vmul.f32 1.442695, %v590_v63 }
 0x3aa   : > { %850 = vpow2.f32 %v591_v1 }
 0x3ac   : > { %v849_v60 = vpop.eup %848 }
 0x3ad   : > { %v483_v61 = vsel %vm208_vm1, %v849_v60, 0.0 }
 0x3ae   : > { %484 = vadd.xlane.f32.xlu0 %v483_v61 }
 0x3b4   : > { %v851_v2 = vpop.eup %850 }
 0x3b5   : > { %v593_v3 = vsel %vm208_vm1, %v851_v2, 0.0 }
 0x3b7   : > { %489 = vrot.lane.b32.xlu1 %v934_v18, %s869_s22 }
 0x3c4   : > { %379 = vrot.lane.b32.xlu0 %v934_v18, %s868_s21 }
 0x3db   : > { %594 = vadd.xlane.f32.xlu1 %v593_v3 }
 0x3ec   : > { %599 = vrot.lane.b32.xlu1 %v934_v18, %s870_s23 }
 0x433   : > { %v374_v4 = vpop.xlane.xlu1 %373 }
 0x434   : > { %852 = vrcp.f32 %v374_v4 }
 0x437   : > { %v490_v10 = vpop.permute.xlu1 %489 }
 0x438   : > { %v495_v12 = vsel %vm270_vm2, %v490_v10, 0 }
 0x43b   : > { %v485_v5 = vpop.xlane.xlu0 %484 }
 0x43c   : > { %854 = vrcp.f32 %v485_v5 }
 0x43e   : > { %v853_v6 = vpop.eup %852 }
 0x43f   : > { %v376_v7 = vmul.f32 %v853_v6, %v847_v58  ;;  %v380_v8 = vpop.permute.xlu0 %379 }
 0x440   : > { %v385_v9 = vsel %vm270_vm2, %v380_v8, 0 }
 0x441   : > { %797 = vmatpush3.bf16.msra.mxu0 %v385_v9  ;;  %v377_v11 = vpack.c.bf16 %v376_v7, %v376_v7 }
 0x442   : > { %808 = vmatprep.subr.bf16.mxu0 %v866_v0 }
 0x444   : > { %799 = vmatmul.mubr.msk.bf16.vlgmr.msra.gmra.mrb[4].mxu0 %vm208_vm1, %v377_v11 }
 0x445   : > { %809 = vmatpush3.bf16.msra.mxu0 %v495_v12  ;;  %810 = vmatprep.mubr.msk.bf16.mxu0 %vm867_vm0, %v866_v0 }
 0x446   : > { %v855_v13 = vpop.eup %854  ;;  %820 = vmatprep.subr.bf16.mxu0 %v866_v0 }
 0x447   : > { %v487_v14 = vmul.f32 %v855_v13, %v849_v60 }
 0x449   : > { %v488_v15 = vpack.c.bf16 %v487_v14, %v487_v14 }
 0x44c   : > { %811 = vmatmul.mubr.msk.bf16.vlgmr.msra.gmra.mrb[8].mxu0 %vm208_vm1, %v488_v15 }
 0x44d   : > { %822 = vmatprep.mubr.msk.bf16.mxu0 %vm867_vm0, %v866_v0 }
 0x468   : > { %v595_v16 = vpop.xlane.xlu1 %594 }
 0x469   : > { %856 = vrcp.f32 %v595_v16 }
 0x46c   : > { %v600_v17 = vpop.permute.xlu1 %599 }
 0x46d   : > { %v605_v18 = vsel %vm270_vm2, %v600_v17, 0 }
 0x46e   : > { %821 = vmatpush3.bf16.msra.mxu0 %v605_v18 }
 0x473   : > { %v857_v19 = vpop.eup %856 }
 0x474   : > { %v597_v20 = vmul.f32 %v857_v19, %v851_v2 }
 0x476   : > { %v598_v21 = vpack.c.bf16 %v597_v20, %v597_v20 }
 0x478   : > { %823 = vmatmul.mubr.msk.bf16.vlgmr.msra.gmra.mrb[12].mxu0 %vm208_vm1, %v598_v21 }
 0x517   : > { %v421_v22 = vpop.f32.mrb[4].mxu0 }
 0x518   : > { %648 = vrot.lane.b32.xlu0 %v421_v22, %s871_s27  ;;  %v800_v23 = vpop.f32.mrb[5].mxu0 }
 0x519   : > { %v424_v24 = vpop.f32.mrb[6].mxu0 }
 0x51a   : > { %v801_v25 = vpop.f32.mrb[7].mxu0 }
 0x51f   : > { %v531_v26 = vpop.f32.mrb[8].mxu0 }
 0x520   : > { %652 = vrot.lane.b32.xlu1 %v531_v26, %s872_s28  ;;  %v812_v0 = vpop.f32.mrb[9].mxu0 }
 0x521   : > { %v534_v27 = vpop.f32.mrb[10].mxu0 }
 0x522   : > { %v813_v28 = vpop.f32.mrb[11].mxu0 }
 0x54b   : > { %v641_v29 = vpop.f32.mrb[12].mxu0 }
 0x54c   : > { %656 = vrot.lane.b32.xlu0 %v641_v29, %s873_s29  ;;  %v824_v30 = vpop.f32.mrb[13].mxu0 }
 0x54d   : > { %v644_v31 = vpop.f32.mrb[14].mxu0 }
 0x54e   : > { %v825_v32 = vpop.f32.mrb[15].mxu0 }
 0x58a   : > { %v649_v34 = vpop.permute.xlu0 %648 }
 0x58b   : > { %v659_v36 = vsel %vm208_vm1, %v955_v33, %v649_v34 }
 0x592   : > { %v653_v35 = vpop.permute.xlu1 %652 }
 0x593   : > { %v661_v37 = vsel %vm660_vm3, %v659_v36, %v653_v35 }
 0x5be   : > { %v657_v38 = vpop.permute.xlu0 %656 }
 0x5bf   : > { %v663_v39 = vsel %vm662_vm4, %v661_v37, %v657_v38 }
 0x5c0   : > { %665 = vst.msk [vmem:[%s199_s5] sm:$0xff] %vm664_vm5, %v663_v39 }
 0x5c1 PF: > { %s13_s12 = sadd.s32 1, %s864_s12  }
 0x5c2   : > { %p10_p4 = scmp.ge.s32.totalorder %s13_s12, 4  }
 0x5c4   :  { %12 = sbr.rel (!%p10_p4) target bundleno = 1 (0x1), region = 68 }

// kernel: transformer_forward.49
= control target key start
LH: loop header
LB: loop body
LE: loop exit
PB: predicated region body
PF: predicated region fallthrough
CT: control target
= control target key end

     0   :  { %v152_v1 = vmov 0.0   ;;  %vm153_vm0 = vmmov 0   ;;  %s204_s0 = inlined_call_operand.vmem [shape: f32[16,32], index: 0, kind: input, shape index: {}]   ;;  %s205_s1 = inlined_call_operand.vmem [shape: bf16[32,60], index: 1, kind: input, shape index: {}]   ;;  %s206_s2 = inlined_call_operand.vmem [shape: f32[1,60], index: 2, kind: input, shape index: {}]   ;;  %s207_s3 = inlined_call_operand.hbm [shape: f32[16,60], index: 3, kind: output, shape index: {}]  }
   0x1   :  { %v126_v0 = vld [vmem:[%s205_s1] sm:$0xff]   ;;  %113 = vmatprep.subr.bf16.mxu0 %v152_v1  ;;  %v127_v2 = vld [vmem:[%s205_s1 + $0x8] sm:$0xff]   ;;  %117 = vmatprep.mubr.msk.bf16.mxu0 %vm153_vm0, %v152_v1 }
   0x2   :  { %114 = vmatpush3.bf16.msra.mxu0 %v126_v0  ;;  %v16_v3 = vld [vmem:[%s204_s0] sm:$0xff]  ;;  %v17_v4 = vld [vmem:[%s204_s0 + $0x8] sm:$0xff] }
   0x3   :  { %115 = vmatprep.subr.bf16.mxu0 %v152_v1 }
   0x4   :  { %8 = vsyncpa [#allocation3], 0  ;;  %v18_v5 = vpack.c.bf16 %v17_v4, %v16_v3  ;;  %vm42_vm1 = vcmask 261120   ;;  %v106_v6 = vld [vmem:[%s206_s2] ss:$0 sm:$0xff]  ;;  %s154_s1 = smov [#allocation2]  }
   0x5   :  { %s95_s22 = sshll.u32 %s154_s1, 4  ;;  %vm87_vm2 = vcmask 490496   ;;  %s96_s22 = int_to_ptr.vmem [resolvable:$true] %s95_s22 }
   0x6   :  { %116 = vmatpush3.bf16.msra.mxu0 %v127_v2  ;;  %s128_s0 = scalar_lea.vmem %s96_s22, 256  ;;  %p133_p1 = scmp.lt.s32.totalorder %s96_s22, %s96_s22 }
   0x7   :  { %p129_p0 = scmp.ne.s32.totalorder %s96_s22, %s128_s0  ;;  %p134_p2 = scmp.lt.s32.totalorder %s128_s0, %s128_s0 }
   0x9   :  { %118 = vmatmul.mubr.msk.bf16.vlgmr.msra.gmra.mrb[0].mxu0 %vm42_vm1, %v18_v5  ;;  %p135_p3 = por %p134_p2, %p133_p1 }
   0xb   :  { %p136_p4 = pnand %p135_p3, %p129_p0 }
  0xdc   :  { %v80_v7 = vpop.f32.mrb[0].mxu0 }
  0xdd   :  { %v81_v8 = vadd.f32 %v106_v6, %v80_v7  ;;  %v119_v9 = vpop.f32.mrb[1].mxu0 }
  0xde   :  { %v83_v10 = vpop.f32.mrb[2].mxu0 }
  0xdf   :  { %88 = vst.msk [vmem:[#allocation2] sm:$0xff] %vm87_vm2, %v81_v8  ;;  %v84_v11 = vadd.f32 %v106_v6, %v83_v10  ;;  %v120_v12 = vpop.f32.mrb[3].mxu0 }
  0xe1   :  { %89 = vst.msk [vmem:[#allocation2 + $0x8] sm:$0xff] %vm87_vm2, %v84_v11 }
  0xe2   :  { %139 = shalt.err (!%p136_p4)
}
  0xe3   :  { %s140_s24 = scalar_lea.hbm %s207_s3, 256 }
  0xe4   :  { %p141_p5 = scmp.ne.s32.totalorder %s207_s3, %s140_s24  ;;  %p144_p6 = scmp.lt.u32.totalorder %s140_s24, %s207_s3 }
  0xe6   :  { %p146_p7 = pnand %p144_p6, %p141_p5 }
  0xe8   :  { %149 = shalt.err (!%p146_p7)
}
  0xe9   :  { %s155_s29 = smov 128   ;;  %s156_s30 = smov 8  }
  0xea   :  { %101 = dma.vmem_to_hbm [thread:$0]  %s96_s22, 256, %s207_s3, [#allocation3], %s155_s29, %s155_s29, %s156_s30  }
  0xeb   :  { %150 = dma.done.wait [#allocation3], 256  }
  0xec   :  { %151 = vsyncadd [#allocation3], 4294967040 }
  0xed   :  { %105 = vsyncpa [#allocation3], 1 }

// kernel: transformer_forward.28
= control target key start
LH: loop header
LB: loop body
LE: loop exit
PB: predicated region body
PF: predicated region fallthrough
CT: control target
= control target key end

     0   :  { %v290_v0 = vmov 0.0   ;;  %vm291_vm0 = vmmov 0   ;;  %vm53_vm1 = vcmask 261120   ;;  %vm140_vm2 = vcmask 523264   ;;  %s381_s1 = inlined_call_operand.vmem [shape: bf16[32,64], index: 1, kind: input, shape index: {}]   ;;  %s382_s0 = inlined_call_operand.vmem [shape: f32[16,32], index: 0, kind: input, shape index: {}]   ;;  %s383_s3 = inlined_call_operand.vmem [shape: bf16[64,32], index: 3, kind: input, shape index: {}]   ;;  %s384_s2 = inlined_call_operand.vmem [shape: f32[1,64], index: 2, kind: input, shape index: {}]   ;;  %s385_s4 = inlined_call_operand.vmem [shape: f32[1,32], index: 4, kind: input, shape index: {}]   ;;  %s386_s5 = inlined_call_operand.vmem [shape: f32[1,32], index: 5, kind: input, shape index: {}]   ;;  %s387_s6 = inlined_call_operand.vmem [shape: f32[1,32], index: 6, kind: input, shape index: {}]   ;;  %s388_s7 = inlined_call_operand.vmem [shape: f32[16,32], index: 7, kind: output, shape index: {}]  }
   0x1   :  { %258 = vmatprep.subr.bf16.mxu0 %v290_v0  ;;  %v280_v1 = vld [vmem:[%s381_s1] sm:$0xff]   ;;  %262 = vmatprep.mubr.msk.bf16.mxu0 %vm291_vm0, %v290_v0  ;;  %v281_v2 = vld [vmem:[%s381_s1 + $0x8] sm:$0xff]   ;;  %v284_v8 = vld [vmem:[%s383_s3 + $0x10] sm:$0xff]  }
   0x2   :  { %266 = vmatprep.subr.bf16.mxu1 %v290_v0  ;;  %274 = vmatprep.mubr.msk.bf16.mxu1 %vm291_vm0, %v290_v0  ;;  %v27_v3 = vld [vmem:[%s382_s0] sm:$0xff]  ;;  %v28_v4 = vld [vmem:[%s382_s0 + $0x8] sm:$0xff]  ;;  %v285_v9 = vld [vmem:[%s383_s3 + $0x18] sm:$0xff]  }
   0x3   :  { %259 = vmatpush3.bf16.msra.mxu0 %v280_v1  ;;  %v282_v5 = vld [vmem:[%s383_s3] sm:$0xff]   ;;  %v283_v6 = vld [vmem:[%s383_s3 + $0x8] sm:$0xff]   ;;  %v29_v7 = vpack.c.bf16 %v28_v4, %v27_v3 }
   0x4   :  { %260 = vmatprep.subr.bf16.mxu0 %v290_v0  ;;  %267 = vmatpush3.bf16.msra.mxu1 %v282_v5  ;;  %v238_v10 = vld [vmem:[%s384_s2] ss:$0 sm:$0xff] }
   0x5   :  { %268 = vmatprep.subr.bf16.mxu1 %v290_v0  ;;  %v242_v20 = vld [vmem:[%s385_s4] ss:$0 sm:$0xff] }
   0x6   :  { %v248_v48 = vld [vmem:[%s386_s5] ss:$0 sm:$0xff] }
   0x7   :  { %261 = vmatpush3.bf16.msra.mxu0 %v281_v2  ;;  %v249_v50 = vld [vmem:[%s387_s6] ss:$0 sm:$0xff] }
   0x8   :  { %269 = vmatpush3.bf16.msra.mxu1 %v283_v6 }
   0x9   :  { %270 = vmatprep.subr.bf16.mxu1 %v290_v0 }
   0xa   :  { %263 = vmatmul.mubr.msk.bf16.vlgmr.msra.gmra.mrb[0].mxu0 %vm53_vm1, %v29_v7 }
   0xc   :  { %271 = vmatpush3.bf16.msra.mxu1 %v284_v8 }
   0xd   :  { %272 = vmatprep.subr.bf16.mxu1 %v290_v0 }
  0x10   :  { %273 = vmatpush3.bf16.msra.mxu1 %v285_v9 }
  0xdd   :  { %v91_v11 = vpop.f32.mrb[0].mxu0 }
  0xde   :  { %v92_v12 = vadd.f32 %v238_v10, %v91_v11  ;;  %v264_v13 = vpop.f32.mrb[1].mxu0 }
  0xdf   :  { %v94_v14 = vpop.f32.mrb[2].mxu0 }
  0xe0   :  { %v95_v15 = vadd.f32 %v238_v10, %v94_v14  ;;  %v265_v16 = vpop.f32.mrb[3].mxu0  ;;  %v98_v17 = vmax.f32 %v92_v12, 0.0 }
  0xe2   :  { %v99_v18 = vmax.f32 %v95_v15, 0.0 }
  0xe4   :  { %v100_v19 = vpack.c.bf16 %v99_v18, %v98_v17 }
  0xe6   :  { %275 = vmatmul.mubr.msk.bf16.vlgmr.msra.gmra.mrb[0].mxu1 %vm140_vm2, %v100_v19 }
 0x1b9   :  { %v178_v21 = vpop.f32.mrb[0].mxu1 }
 0x1ba   :  { %v179_v22 = vadd.f32 %v242_v20, %v178_v21  ;;  %v276_v23 = vpop.f32.mrb[1].mxu1 }
 0x1bb   :  { %v181_v24 = vpop.f32.mrb[2].mxu1 }
 0x1bc   :  { %v182_v25 = vadd.f32 %v242_v20, %v181_v24  ;;  %v277_v26 = vpop.f32.mrb[3].mxu1  ;;  %v185_v27 = vadd.f32 %v179_v22, %v27_v3 }
 0x1be   :  { %v189_v28 = vsel %vm53_vm1, %v185_v27, 0.0  ;;  %v186_v29 = vadd.f32 %v182_v25, %v28_v4 }
 0x1bf   :  { %190 = vadd.xlane.f32.xlu0 %v189_v28 }
 0x1c0   :  { %v192_v30 = vsel %vm53_vm1, %v186_v29, 0.0 }
 0x1c3   :  { %193 = vadd.xlane.f32.xlu0 %v192_v30 }
 0x24c   :  { %v191_v31 = vpop.xlane.xlu0 %190 }
 0x24d   :  { %v196_v32 = vmul.f32 0.03125, %v191_v31 }
 0x24f   :  { %v198_v33 = vsub.f32 %v185_v27, %v196_v32 }
 0x250   :  { %v194_v34 = vpop.xlane.xlu0 %193 }
 0x251   :  { %v197_v35 = vmul.f32 0.03125, %v194_v34  ;;  %v200_v36 = vmul.f32 %v198_v33, %v198_v33 }
 0x253   :  { %v199_v37 = vsub.f32 %v186_v29, %v197_v35  ;;  %v202_v38 = vsel %vm53_vm1, %v200_v36, 0.0 }
 0x254   :  { %203 = vadd.xlane.f32.xlu1 %v202_v38 }
 0x255   :  { %v201_v39 = vmul.f32 %v199_v37, %v199_v37 }
 0x257   :  { %v205_v40 = vsel %vm53_vm1, %v201_v39, 0.0 }
 0x258   :  { %206 = vadd.xlane.f32.xlu1 %v205_v40 }
 0x2e1   :  { %v204_v41 = vpop.xlane.xlu1 %203 }
 0x2e2   :  { %v208_v42 = vmul.f32 0.03125, %v204_v41 }
 0x2e4   :  { %v210_v43 = vadd.f32 1e-05, %v208_v42 }
 0x2e5   :  { %v207_v44 = vpop.xlane.xlu1 %206 }
 0x2e6   :  { %286 = vrsqrt.f32 %v210_v43  ;;  %v209_v45 = vmul.f32 0.03125, %v207_v44 }
 0x2e8   :  { %v211_v46 = vadd.f32 1e-05, %v209_v45 }
 0x2ea   :  { %288 = vrsqrt.f32 %v211_v46 }
 0x2f0   :  { %v287_v47 = vpop.eup %286 }
 0x2f1   :  { %v214_v49 = vmul.f32 %v287_v47, %v198_v33 }
 0x2f3   :  { %v222_v51 = vmul.f32 %v248_v48, %v214_v49 }
 0x2f4   :  { %v289_v52 = vpop.eup %288 }
 0x2f5   :  { %v230_v53 = vadd.f32 %v249_v50, %v222_v51  ;;  %v215_v54 = vmul.f32 %v289_v52, %v199_v37 }
 0x2f7   :  { %232 = vst.msk [vmem:[%s388_s7] sm:$0xff] %vm53_vm1, %v230_v53  ;;  %v223_v55 = vmul.f32 %v248_v48, %v215_v54 }
 0x2f9   :  { %v231_v56 = vadd.f32 %v249_v50, %v223_v55 }
 0x2fb   :  { %233 = vst.msk [vmem:[%s388_s7 + $0x8] sm:$0xff] %vm53_vm1, %v231_v56 }

</bundles_post_ra>
